<compile_context>
chip_gen: v7x
topology: tpu7x:2x2x1
jax: 0.10.0
libtpu: 0.0.40
codegen_flags: <defaults>
</compile_context>

<pallas_src>
import functools

import numpy as np
import jax
import jax.numpy as jnp
from jax import lax
from jax.experimental import pallas as pl
from jax.experimental.pallas import tpu as pltpu

BN_EPS = 1e-5


# ------------------------------ Pallas kernel -------------------------------

def _ablock_kernel(x_ref, w1sc_ref, b1_ref, w2_ref, b2_ref, w3_ref, b3_ref,
                   o_ref, *, H, W, PAD, rates, c1, c2):
    """Fused ABlock forward for one image (channels-first, M = H*W on lanes).

    x_ref   : (1, Cin, M)         bf16  input (NCHW, spatial flattened)
    w1sc_ref: (C1+Cout, Cin)      bf16  fused [conv1 ; shortcut] weights (BN folded)
    b1_ref  : (C1, 1)             f32   conv1 folded BN bias
    w2_ref  : (n_rates*9, C2, C1) bf16  per-(rate, tap) dense grouped 3x3 weights
    b2_ref  : (n_rates, C2, 1)    f32   per-rate folded BN bias
    w3_ref  : (n_rates, Cout, C2) bf16  per-rate conv3 weights (BN folded)
    b3_ref  : (Cout, 1)           f32   conv3 bias + shortcut bias (pre-summed)
    o_ref   : (1, Cout, M)        f32   output (NCHW, spatial flattened)
    """
    M = H * W

    x = x_ref[0]                                           # (Cin, M) bf16

    # Fused conv1 + shortcut 1x1: one matmul, M on the MXU output lanes.
    # TODO(synk): when in_c == out_c the shortcut is identity*BN-scale -> could
    # be a pure f32 VPU multiply instead of rows of this matmul.
    hall = jnp.dot(w1sc_ref[...], x, preferred_element_type=jnp.float32)
    h1 = jnp.maximum(hall[:c1] + b1_ref[...], 0.0)         # (C1, M) f32
    acc = hall[c1:] + b3_ref[...]                          # (Cout, M) f32

    # Zero-padded, lane-aligned flat feature rows for the dilated taps.
    # PAD is a multiple of 128 and >= R*(W+1), so vertical out-of-range taps
    # read zeros; only horizontal row-wrap needs a mask.
    h1b = h1.astype(jnp.bfloat16)
    zpad = jnp.zeros((c1, PAD), jnp.bfloat16)
    h1pad = jnp.concatenate([zpad, h1b, zpad], axis=1)     # (C1, M + 2*PAD)

    # Column index within an image row (hoisted; used for wrap masks).
    xcol = lax.broadcasted_iota(jnp.int32, (1, M), 1) % W

    for ri, r in enumerate(rates):
        # Grouped dilated 3x3 as 9 accumulating per-tap matmuls (no concat).
        # TODO(synk): for production sizes (C2 >= 128, many groups) use
        # per-group matmuls and a single stacked (4*C2, Cout) conv3 matmul.
        acc2 = None
        for ky in range(3):
            dy = ky - 1
            if abs(dy) * r >= H:          # tap samples only zero padding
                continue
            for kx in range(3):
                dx = kx - 1
                if abs(dx) * r >= W:      # tap samples only zero padding
                    continue
                off = dy * r * W + dx * r
                if off == 0:
                    tap = h1b
                else:
                    tap = h1pad[:, PAD + off: PAD + off + M]     # (C1, M)
                    # Mask columns that wrapped across an image row.
                    if dx > 0:
                        tap = jnp.where(xcol < W - dx * r, tap, 0)
                    elif dx < 0:
                        tap = jnp.where(xcol >= -dx * r, tap, 0)
                d = jnp.dot(w2_ref[ri * 9 + ky * 3 + kx], tap,
                            preferred_element_type=jnp.float32)  # (C2, M)
                acc2 = d if acc2 is None else acc2 + d
        br = jnp.maximum(acc2 + b2_ref[ri], 0.0).astype(jnp.bfloat16)
        # conv3 contribution accumulates straight into the shared accumulator.
        acc = acc + jnp.dot(w3_ref[ri], br, preferred_element_type=jnp.float32)

    # Residual ReLU; output already channels-first -> lane-dense store.
    o_ref[0] = jnp.maximum(acc, 0.0).astype(o_ref.dtype)


# ------------------------------ Pallas wrapper -------------------------------

def ablock_forward(x_nchw, kp, rates, *, c1, c2, out_c):
    N, Cin, H, W = x_nchw.shape
    M = H * W
    R = max(rates)
    PAD = -(-(R * (W + 1)) // 128) * 128          # lane-aligned flat halo
    kern = functools.partial(_ablock_kernel, H=H, W=W, PAD=PAD,
                             rates=tuple(rates), c1=c1, c2=c2)
    # bf16 input halves HBM->VMEM DMA; output stays f32 for module fidelity.
    x3 = x_nchw.astype(jnp.bfloat16).reshape(N, Cin, M)
    # TODO(synk): for large H*W, add a second "parallel" grid axis over spatial
    # row tiles (halo via memory_space=pl.ANY + pltpu.make_async_copy), sized
    # against v7x's 64 MiB VMEM; this also keeps both v7x TCs busy at small N.
    out = pl.pallas_call(
        kern,
        out_shape=jax.ShapeDtypeStruct((N, out_c, M), jnp.float32),
        grid=(N,),
        in_specs=[
            pl.BlockSpec((1, Cin, M), lambda n: (n, 0, 0)),
            pl.BlockSpec(kp['w1sc'].shape, lambda n: (0, 0)),
            pl.BlockSpec(kp['b1'].shape, lambda n: (0, 0)),
            pl.BlockSpec(kp['w2'].shape, lambda n: (0, 0, 0)),
            pl.BlockSpec(kp['b2'].shape, lambda n: (0, 0, 0)),
            pl.BlockSpec(kp['w3'].shape, lambda n: (0, 0, 0)),
            pl.BlockSpec(kp['b3'].shape, lambda n: (0, 0)),
        ],
        out_specs=pl.BlockSpec((1, out_c, M), lambda n: (n, 0, 0)),
        compiler_params=pltpu.CompilerParams(
            dimension_semantics=("parallel",),
            vmem_limit_bytes=32 * 1024 * 1024),
    )(x3, kp['w1sc'], kp['b1'], kp['w2'], kp['b2'], kp['w3'], kp['b3'])
    return out.reshape(N, out_c, H, W)


# --------------------------- parameters & folding ----------------------------

def _fold_bn(gamma, beta, mean, var):
    s = gamma / jnp.sqrt(var + BN_EPS)
    return s, beta - mean * s


def init_params(key, in_c, c1, c2, out_c, group_width, rates):
    groups = c2 // group_width
    cin_g = c1 // groups
    ks = iter(jax.random.split(key, 128))

    def nrm(shape, scale=0.1):
        return scale * jax.random.normal(next(ks), shape, jnp.float32)

    def bn(c):
        gamma = 1.0 + nrm((c,))
        beta = nrm((c,))
        mean = nrm((c,))
        var = 1.0 + 0.1 * jax.random.uniform(next(ks), (c,), jnp.float32)
        return _fold_bn(gamma, beta, mean, var)

    p = {}
    p['w1'] = nrm((in_c, c1))                                # conv1 1x1 as matmul
    p['s1'], p['b1'] = bn(c1)
    p['w2'], p['s2'], p['b2'] = [], [], []
    for _ in rates:                                          # torch grouped layout
        p['w2'].append(nrm((c2, cin_g, 3, 3)))
        s, b = bn(c2)
        p['s2'].append(s)
        p['b2'].append(b)
    c2cat = c2 * len(rates)
    p['w3'] = nrm((c2cat, out_c))
    p['s3'], p['b3'] = bn(out_c)
    if in_c != out_c:
        p['wsc'] = nrm((in_c, out_c))
        p['ssc'], p['bsc'] = bn(out_c)
    else:                                                    # identity shortcut
        p['wsc'] = jnp.eye(in_c, dtype=jnp.float32)
        p['ssc'] = jnp.ones((out_c,), jnp.float32)
        p['bsc'] = jnp.zeros((out_c,), jnp.float32)
    return p, groups


def fold_params(p, groups, rates, c1):
    """Fold BN scales into channels-first bf16 matmul weights; fuse conv1+shortcut;
    densify grouped 3x3 weights into per-(rate, tap) (C2, C1) blocks."""
    c2 = p['w2'][0].shape[0]
    out_c = p['w3'].shape[1]
    cout_g = c2 // groups
    cin_g = c1 // groups

    # Fused conv1 + shortcut: rows [C1 ; Cout], columns Cin.
    w1_cf = (p['w1'] * p['s1'][None, :]).T                    # (C1, Cin)
    wsc_cf = (p['wsc'] * p['ssc'][None, :]).T                 # (Cout, Cin)
    w1sc = jnp.concatenate([w1_cf, wsc_cf], axis=0).astype(jnp.bfloat16)
    b1 = p['b1'].reshape(c1, 1)
    b3sc = (p['b3'] + p['bsc']).reshape(out_c, 1)

    # Grouped 3x3 -> dense block-diagonal per-tap (C2, C1), tap = ky*3 + kx.
    w2_taps, b2 = [], []
    for i in range(len(rates)):
        w = p['w2'][i]                                        # (C2, cin_g, 3, 3)
        wd = jnp.zeros((c2, c1, 3, 3), w.dtype)
        for g in range(groups):
            wd = wd.at[g * cout_g:(g + 1) * cout_g,
                       g * cin_g:(g + 1) * cin_g].set(w[g * cout_g:(g + 1) * cout_g])
        wd = wd * p['s2'][i][:, None, None, None]             # fold BN scale
        w2_taps.append(jnp.transpose(wd, (2, 3, 0, 1)).reshape(9, c2, c1))
        b2.append(p['b2'][i].reshape(c2, 1))
    w2 = jnp.concatenate(w2_taps, axis=0).astype(jnp.bfloat16)  # (nr*9, C2, C1)
    b2 = jnp.stack(b2, axis=0)                                  # (nr, C2, 1)

    # conv3: per-rate (Cout, C2) channels-first, BN scale folded.
    w3r = []
    for i in range(len(rates)):
        blk = p['w3'][i * c2:(i + 1) * c2, :] * p['s3'][None, :]  # (C2, Cout)
        w3r.append(blk.T)                                         # (Cout, C2)
    w3 = jnp.stack(w3r, axis=0).astype(jnp.bfloat16)              # (nr, Cout, C2)

    return dict(w1sc=w1sc, b1=b1, w2=w2, b2=b2, w3=w3, b3=b3sc)


# --------------------------- pure-JAX f32 reference --------------------------

def ref_forward(x_nchw, p, groups, rates):
    hi = jax.lax.Precision.HIGHEST
    x = jnp.transpose(x_nchw, (0, 2, 3, 1)).astype(jnp.float32)       # NHWC
    h1 = jnp.einsum('nhwc,cd->nhwd', x, p['w1'] * p['s1'][None, :],
                    precision=hi)
    h1 = jnp.maximum(h1 + p['b1'], 0.0)
    branches = []
    for i, r in enumerate(rates):
        w_hwio = jnp.transpose(p['w2'][i], (2, 3, 1, 0))              # HWIO
        y = jax.lax.conv_general_dilated(
            h1, w_hwio, (1, 1), [(r, r), (r, r)],
            rhs_dilation=(r, r),
            dimension_numbers=('NHWC', 'HWIO', 'NHWC'),
            feature_group_count=groups, precision=hi)
        branches.append(jnp.maximum(y * p['s2'][i] + p['b2'][i], 0.0))
    feat = jnp.concatenate(branches, axis=-1)
    y = jnp.einsum('nhwc,cd->nhwd', feat, p['w3'] * p['s3'][None, :],
                   precision=hi) + p['b3']
    sc = jnp.einsum('nhwc,cd->nhwd', x, p['wsc'] * p['ssc'][None, :],
                    precision=hi) + p['bsc']
    out = jnp.maximum(y + sc, 0.0)
    return jnp.transpose(out, (0, 3, 1, 2))                            # NCHW


# ----------------------------------- main ------------------------------------

if __name__ == "__main__":
    key = jax.random.PRNGKey(0)
    kx, kw = jax.random.split(key)

    in_c, c1, c2, out_c, group_width = 8, 16, 16, 32, 8      # groups = 2
    rates = (1, 6, 12, 18)                                   # ABlock default
    N, H, W = 2, 16, 16

    x = jax.random.normal(kx, (N, in_c, H, W), jnp.float32)  # NCHW like PyTorch
    params, groups = init_params(kw, in_c, c1, c2, out_c, group_width, rates)
    kparams = fold_params(params, groups, rates, c1)

    fwd = jax.jit(functools.partial(ablock_forward, rates=rates,
                                    c1=c1, c2=c2, out_c=out_c))
    out = jax.block_until_ready(fwd(x, kparams))
    assert out.shape == (N, out_c, H, W)

    ref = jax.block_until_ready(ref_forward(x, params, groups, rates))
    # bf16 MXU inputs with f32 accumulation vs f32 HIGHEST reference.
    np.testing.assert_allclose(np.asarray(out), np.asarray(ref),
                               rtol=3e-2, atol=3e-2)
    print("KERNEL_OK")
</pallas_src>

<mosaic_0001>
module attributes {stable_mosaic.version = 11 : i64} {
  func.func @_ablock_kernel(%arg0: i32, %arg1: memref<1x8x256xbf16, #tpu.memory_space<vmem>>, %arg2: memref<48x8xbf16, #tpu.memory_space<vmem>>, %arg3: memref<16x1xf32, #tpu.memory_space<vmem>>, %arg4: memref<36x16x16xbf16, #tpu.memory_space<vmem>>, %arg5: memref<4x16x1xf32, #tpu.memory_space<vmem>>, %arg6: memref<4x32x16xbf16, #tpu.memory_space<vmem>>, %arg7: memref<32x1xf32, #tpu.memory_space<vmem>>, %arg8: memref<1x32x256xf32, #tpu.memory_space<vmem>>) attributes {dimension_semantics = [#tpu.dimension_semantics<parallel>], iteration_bounds = array<i64: 2>, scalar_prefetch = 0 : i64, scratch_operands = 0 : i64, tpu.core_type = #tpu.core_type<tc>, window_params = [{transform_indices = @transform_0, window_bounds = array<i64: 1, 8, 256>}, {pipeline_mode = #tpu.pipeline_mode<synchronous>, transform_indices = @transform_1, window_bounds = array<i64: 48, 8>}, {pipeline_mode = #tpu.pipeline_mode<synchronous>, transform_indices = @transform_2, window_bounds = array<i64: 16, 1>}, {pipeline_mode = #tpu.pipeline_mode<synchronous>, transform_indices = @transform_3, window_bounds = array<i64: 36, 16, 16>}, {pipeline_mode = #tpu.pipeline_mode<synchronous>, transform_indices = @transform_4, window_bounds = array<i64: 4, 16, 1>}, {pipeline_mode = #tpu.pipeline_mode<synchronous>, transform_indices = @transform_5, window_bounds = array<i64: 4, 32, 16>}, {pipeline_mode = #tpu.pipeline_mode<synchronous>, transform_indices = @transform_6, window_bounds = array<i64: 32, 1>}, {transform_indices = @transform_7, window_bounds = array<i64: 1, 32, 256>}]} {
    %c0 = arith.constant 0 : index
    %c0_0 = arith.constant 0 : index
    %c0_1 = arith.constant 0 : index
    %0 = vector.load %arg1[%c0, %c0_0, %c0_1] : memref<1x8x256xbf16, #tpu.memory_space<vmem>>, vector<1x8x256xbf16>
    %1 = vector.shape_cast %0 : vector<1x8x256xbf16> to vector<8x256xbf16>
    %c0_2 = arith.constant 0 : index
    %c0_3 = arith.constant 0 : index
    %2 = vector.load %arg2[%c0_2, %c0_3] : memref<48x8xbf16, #tpu.memory_space<vmem>>, vector<48x8xbf16>
    %cst = arith.constant dense<0.000000e+00> : vector<48x256xf32>
    %3 = tpu.matmul %2, %1, %cst {dimension_numbers = #tpu.dot_dimension_numbers<[1], [0], [0], [1], [0, 0, 1, 1], [], []>} : vector<48x8xbf16>, vector<8x256xbf16>, vector<48x256xf32> -> vector<48x256xf32>
    %4 = vector.extract_strided_slice %3 {offsets = [0, 0], sizes = [16, 256], strides = [1, 1]} : vector<48x256xf32> to vector<16x256xf32>
    %c0_4 = arith.constant 0 : index
    %c0_5 = arith.constant 0 : index
    %5 = vector.load %arg3[%c0_4, %c0_5] : memref<16x1xf32, #tpu.memory_space<vmem>>, vector<16x1xf32>
    %6 = vector.broadcast %5 : vector<16x1xf32> to vector<16x256xf32>
    %7 = arith.addf %4, %6 : vector<16x256xf32>
    %cst_6 = arith.constant 0.000000e+00 : f32
    %8 = vector.broadcast %cst_6 : f32 to vector<16x256xf32>
    %9 = arith.maximumf %7, %8 : vector<16x256xf32>
    %10 = vector.extract_strided_slice %3 {offsets = [16, 0], sizes = [32, 256], strides = [1, 1]} : vector<48x256xf32> to vector<32x256xf32>
    %c0_7 = arith.constant 0 : index
    %c0_8 = arith.constant 0 : index
    %11 = vector.load %arg7[%c0_7, %c0_8] : memref<32x1xf32, #tpu.memory_space<vmem>>, vector<32x1xf32>
    %12 = vector.broadcast %11 : vector<32x1xf32> to vector<32x256xf32>
    %13 = arith.addf %10, %12 : vector<32x256xf32>
    %14 = arith.truncf %9 : vector<16x256xf32> to vector<16x256xbf16>
    %cst_9 = arith.constant 0.000000e+00 : bf16
    %15 = vector.broadcast %cst_9 : bf16 to vector<16x384xbf16>
    %16 = tpu.concatenate %15, %14, %15 in 1 : vector<16x384xbf16>, vector<16x256xbf16>, vector<16x384xbf16> -> vector<16x1024xbf16>
    %17 = tpu.iota {dimensions = array<i32: 1>} : vector<1x256xi32>
    %c16_i32 = arith.constant 16 : i32
    %c0_i32 = arith.constant 0 : i32
    %18 = arith.cmpi eq, %c16_i32, %c0_i32 : i32
    %c1_i32 = arith.constant 1 : i32
    %19 = arith.select %18, %c1_i32, %c16_i32 : i32
    %20 = vector.broadcast %19 : i32 to vector<1x256xi32>
    %21 = arith.remsi %17, %20 : vector<1x256xi32>
    %c0_i32_10 = arith.constant 0 : i32
    %22 = vector.broadcast %c0_i32_10 : i32 to vector<1x256xi32>
    %23 = arith.cmpi ne, %21, %22 : vector<1x256xi32>
    %c0_i32_11 = arith.constant 0 : i32
    %24 = vector.broadcast %c0_i32_11 : i32 to vector<1x256xi32>
    %25 = arith.cmpi slt, %21, %24 : vector<1x256xi32>
    %c0_i32_12 = arith.constant 0 : i32
    %26 = arith.cmpi slt, %19, %c0_i32_12 : i32
    %27 = vector.broadcast %26 : i1 to vector<1x256xi1>
    %28 = vector.broadcast %27 : vector<1x256xi1> to vector<1x256xi1>
    %29 = arith.xori %25, %28 : vector<1x256xi1>
    %30 = arith.andi %29, %23 : vector<1x256xi1>
    %31 = vector.broadcast %19 : i32 to vector<1x256xi32>
    %32 = arith.addi %21, %31 : vector<1x256xi32>
    %33 = arith.select %30, %32, %21 : vector<1x256xi1>, vector<1x256xi32>
    %34 = vector.extract_strided_slice %16 {offsets = [0, 367], sizes = [16, 256], strides = [1, 1]} : vector<16x1024xbf16> to vector<16x256xbf16>
    %c1_i32_13 = arith.constant 1 : i32
    %35 = vector.broadcast %c1_i32_13 : i32 to vector<1x256xi32>
    %36 = arith.cmpi sge, %33, %35 : vector<1x256xi32>
    %c0_i32_14 = arith.constant 0 : i32
    %37 = arith.sitofp %c0_i32_14 : i32 to bf16
    %38 = vector.shape_cast %36 : vector<1x256xi1> to vector<1x256xi1>
    %39 = vector.broadcast %38 : vector<1x256xi1> to vector<16x256xi1>
    %40 = vector.broadcast %37 : bf16 to vector<16x256xbf16>
    %41 = arith.select %39, %34, %40 : vector<16x256xi1>, vector<16x256xbf16>
    %c0_15 = arith.constant 0 : index
    %c0_16 = arith.constant 0 : index
    %c0_17 = arith.constant 0 : index
    %42 = vector.load %arg4[%c0_15, %c0_16, %c0_17] : memref<36x16x16xbf16, #tpu.memory_space<vmem>>, vector<1x16x16xbf16>
    %43 = vector.shape_cast %42 : vector<1x16x16xbf16> to vector<16x16xbf16>
    %cst_18 = arith.constant dense<0.000000e+00> : vector<16x256xf32>
    %44 = tpu.matmul %43, %41, %cst_18 {dimension_numbers = #tpu.dot_dimension_numbers<[1], [0], [0], [1], [0, 0, 1, 1], [], []>} : vector<16x16xbf16>, vector<16x256xbf16>, vector<16x256xf32> -> vector<16x256xf32>
    %45 = vector.extract_strided_slice %16 {offsets = [0, 368], sizes = [16, 256], strides = [1, 1]} : vector<16x1024xbf16> to vector<16x256xbf16>
    %c1 = arith.constant 1 : index
    %c0_19 = arith.constant 0 : index
    %c0_20 = arith.constant 0 : index
    %46 = vector.load %arg4[%c1, %c0_19, %c0_20] : memref<36x16x16xbf16, #tpu.memory_space<vmem>>, vector<1x16x16xbf16>
    %47 = vector.shape_cast %46 : vector<1x16x16xbf16> to vector<16x16xbf16>
    %cst_21 = arith.constant dense<0.000000e+00> : vector<16x256xf32>
    %48 = tpu.matmul %47, %45, %cst_21 {dimension_numbers = #tpu.dot_dimension_numbers<[1], [0], [0], [1], [0, 0, 1, 1], [], []>} : vector<16x16xbf16>, vector<16x256xbf16>, vector<16x256xf32> -> vector<16x256xf32>
    %49 = arith.addf %44, %48 : vector<16x256xf32>
    %50 = vector.extract_strided_slice %16 {offsets = [0, 369], sizes = [16, 256], strides = [1, 1]} : vector<16x1024xbf16> to vector<16x256xbf16>
    %c15_i32 = arith.constant 15 : i32
    %51 = vector.broadcast %c15_i32 : i32 to vector<1x256xi32>
    %52 = arith.cmpi slt, %33, %51 : vector<1x256xi32>
    %c0_i32_22 = arith.constant 0 : i32
    %53 = arith.sitofp %c0_i32_22 : i32 to bf16
    %54 = vector.shape_cast %52 : vector<1x256xi1> to vector<1x256xi1>
    %55 = vector.broadcast %54 : vector<1x256xi1> to vector<16x256xi1>
    %56 = vector.broadcast %53 : bf16 to vector<16x256xbf16>
    %57 = arith.select %55, %50, %56 : vector<16x256xi1>, vector<16x256xbf16>
    %c2 = arith.constant 2 : index
    %c0_23 = arith.constant 0 : index
    %c0_24 = arith.constant 0 : index
    %58 = vector.load %arg4[%c2, %c0_23, %c0_24] : memref<36x16x16xbf16, #tpu.memory_space<vmem>>, vector<1x16x16xbf16>
    %59 = vector.shape_cast %58 : vector<1x16x16xbf16> to vector<16x16xbf16>
    %cst_25 = arith.constant dense<0.000000e+00> : vector<16x256xf32>
    %60 = tpu.matmul %59, %57, %cst_25 {dimension_numbers = #tpu.dot_dimension_numbers<[1], [0], [0], [1], [0, 0, 1, 1], [], []>} : vector<16x16xbf16>, vector<16x256xbf16>, vector<16x256xf32> -> vector<16x256xf32>
    %61 = arith.addf %49, %60 : vector<16x256xf32>
    %62 = vector.extract_strided_slice %16 {offsets = [0, 383], sizes = [16, 256], strides = [1, 1]} : vector<16x1024xbf16> to vector<16x256xbf16>
    %c1_i32_26 = arith.constant 1 : i32
    %63 = vector.broadcast %c1_i32_26 : i32 to vector<1x256xi32>
    %64 = arith.cmpi sge, %33, %63 : vector<1x256xi32>
    %c0_i32_27 = arith.constant 0 : i32
    %65 = arith.sitofp %c0_i32_27 : i32 to bf16
    %66 = vector.shape_cast %64 : vector<1x256xi1> to vector<1x256xi1>
    %67 = vector.broadcast %66 : vector<1x256xi1> to vector<16x256xi1>
    %68 = vector.broadcast %65 : bf16 to vector<16x256xbf16>
    %69 = arith.select %67, %62, %68 : vector<16x256xi1>, vector<16x256xbf16>
    %c3 = arith.constant 3 : index
    %c0_28 = arith.constant 0 : index
    %c0_29 = arith.constant 0 : index
    %70 = vector.load %arg4[%c3, %c0_28, %c0_29] : memref<36x16x16xbf16, #tpu.memory_space<vmem>>, vector<1x16x16xbf16>
    %71 = vector.shape_cast %70 : vector<1x16x16xbf16> to vector<16x16xbf16>
    %cst_30 = arith.constant dense<0.000000e+00> : vector<16x256xf32>
    %72 = tpu.matmul %71, %69, %cst_30 {dimension_numbers = #tpu.dot_dimension_numbers<[1], [0], [0], [1], [0, 0, 1, 1], [], []>} : vector<16x16xbf16>, vector<16x256xbf16>, vector<16x256xf32> -> vector<16x256xf32>
    %73 = arith.addf %61, %72 : vector<16x256xf32>
    %c4 = arith.constant 4 : index
    %c0_31 = arith.constant 0 : index
    %c0_32 = arith.constant 0 : index
    %74 = vector.load %arg4[%c4, %c0_31, %c0_32] : memref<36x16x16xbf16, #tpu.memory_space<vmem>>, vector<1x16x16xbf16>
    %75 = vector.shape_cast %74 : vector<1x16x16xbf16> to vector<16x16xbf16>
    %cst_33 = arith.constant dense<0.000000e+00> : vector<16x256xf32>
    %76 = tpu.matmul %75, %14, %cst_33 {dimension_numbers = #tpu.dot_dimension_numbers<[1], [0], [0], [1], [0, 0, 1, 1], [], []>} : vector<16x16xbf16>, vector<16x256xbf16>, vector<16x256xf32> -> vector<16x256xf32>
    %77 = arith.addf %73, %76 : vector<16x256xf32>
    %78 = vector.extract_strided_slice %16 {offsets = [0, 385], sizes = [16, 256], strides = [1, 1]} : vector<16x1024xbf16> to vector<16x256xbf16>
    %c15_i32_34 = arith.constant 15 : i32
    %79 = vector.broadcast %c15_i32_34 : i32 to vector<1x256xi32>
    %80 = arith.cmpi slt, %33, %79 : vector<1x256xi32>
    %c0_i32_35 = arith.constant 0 : i32
    %81 = arith.sitofp %c0_i32_35 : i32 to bf16
    %82 = vector.shape_cast %80 : vector<1x256xi1> to vector<1x256xi1>
    %83 = vector.broadcast %82 : vector<1x256xi1> to vector<16x256xi1>
    %84 = vector.broadcast %81 : bf16 to vector<16x256xbf16>
    %85 = arith.select %83, %78, %84 : vector<16x256xi1>, vector<16x256xbf16>
    %c5 = arith.constant 5 : index
    %c0_36 = arith.constant 0 : index
    %c0_37 = arith.constant 0 : index
    %86 = vector.load %arg4[%c5, %c0_36, %c0_37] : memref<36x16x16xbf16, #tpu.memory_space<vmem>>, vector<1x16x16xbf16>
    %87 = vector.shape_cast %86 : vector<1x16x16xbf16> to vector<16x16xbf16>
    %cst_38 = arith.constant dense<0.000000e+00> : vector<16x256xf32>
    %88 = tpu.matmul %87, %85, %cst_38 {dimension_numbers = #tpu.dot_dimension_numbers<[1], [0], [0], [1], [0, 0, 1, 1], [], []>} : vector<16x16xbf16>, vector<16x256xbf16>, vector<16x256xf32> -> vector<16x256xf32>
    %89 = arith.addf %77, %88 : vector<16x256xf32>
    %90 = vector.extract_strided_slice %16 {offsets = [0, 399], sizes = [16, 256], strides = [1, 1]} : vector<16x1024xbf16> to vector<16x256xbf16>
    %c1_i32_39 = arith.constant 1 : i32
    %91 = vector.broadcast %c1_i32_39 : i32 to vector<1x256xi32>
    %92 = arith.cmpi sge, %33, %91 : vector<1x256xi32>
    %c0_i32_40 = arith.constant 0 : i32
    %93 = arith.sitofp %c0_i32_40 : i32 to bf16
    %94 = vector.shape_cast %92 : vector<1x256xi1> to vector<1x256xi1>
    %95 = vector.broadcast %94 : vector<1x256xi1> to vector<16x256xi1>
    %96 = vector.broadcast %93 : bf16 to vector<16x256xbf16>
    %97 = arith.select %95, %90, %96 : vector<16x256xi1>, vector<16x256xbf16>
    %c6 = arith.constant 6 : index
    %c0_41 = arith.constant 0 : index
    %c0_42 = arith.constant 0 : index
    %98 = vector.load %arg4[%c6, %c0_41, %c0_42] : memref<36x16x16xbf16, #tpu.memory_space<vmem>>, vector<1x16x16xbf16>
    %99 = vector.shape_cast %98 : vector<1x16x16xbf16> to vector<16x16xbf16>
    %cst_43 = arith.constant dense<0.000000e+00> : vector<16x256xf32>
    %100 = tpu.matmul %99, %97, %cst_43 {dimension_numbers = #tpu.dot_dimension_numbers<[1], [0], [0], [1], [0, 0, 1, 1], [], []>} : vector<16x16xbf16>, vector<16x256xbf16>, vector<16x256xf32> -> vector<16x256xf32>
    %101 = arith.addf %89, %100 : vector<16x256xf32>
    %102 = vector.extract_strided_slice %16 {offsets = [0, 400], sizes = [16, 256], strides = [1, 1]} : vector<16x1024xbf16> to vector<16x256xbf16>
    %c7 = arith.constant 7 : index
    %c0_44 = arith.constant 0 : index
    %c0_45 = arith.constant 0 : index
    %103 = vector.load %arg4[%c7, %c0_44, %c0_45] : memref<36x16x16xbf16, #tpu.memory_space<vmem>>, vector<1x16x16xbf16>
    %104 = vector.shape_cast %103 : vector<1x16x16xbf16> to vector<16x16xbf16>
    %cst_46 = arith.constant dense<0.000000e+00> : vector<16x256xf32>
    %105 = tpu.matmul %104, %102, %cst_46 {dimension_numbers = #tpu.dot_dimension_numbers<[1], [0], [0], [1], [0, 0, 1, 1], [], []>} : vector<16x16xbf16>, vector<16x256xbf16>, vector<16x256xf32> -> vector<16x256xf32>
    %106 = arith.addf %101, %105 : vector<16x256xf32>
    %107 = vector.extract_strided_slice %16 {offsets = [0, 401], sizes = [16, 256], strides = [1, 1]} : vector<16x1024xbf16> to vector<16x256xbf16>
    %c15_i32_47 = arith.constant 15 : i32
    %108 = vector.broadcast %c15_i32_47 : i32 to vector<1x256xi32>
    %109 = arith.cmpi slt, %33, %108 : vector<1x256xi32>
    %c0_i32_48 = arith.constant 0 : i32
    %110 = arith.sitofp %c0_i32_48 : i32 to bf16
    %111 = vector.shape_cast %109 : vector<1x256xi1> to vector<1x256xi1>
    %112 = vector.broadcast %111 : vector<1x256xi1> to vector<16x256xi1>
    %113 = vector.broadcast %110 : bf16 to vector<16x256xbf16>
    %114 = arith.select %112, %107, %113 : vector<16x256xi1>, vector<16x256xbf16>
    %c8 = arith.constant 8 : index
    %c0_49 = arith.constant 0 : index
    %c0_50 = arith.constant 0 : index
    %115 = vector.load %arg4[%c8, %c0_49, %c0_50] : memref<36x16x16xbf16, #tpu.memory_space<vmem>>, vector<1x16x16xbf16>
    %116 = vector.shape_cast %115 : vector<1x16x16xbf16> to vector<16x16xbf16>
    %cst_51 = arith.constant dense<0.000000e+00> : vector<16x256xf32>
    %117 = tpu.matmul %116, %114, %cst_51 {dimension_numbers = #tpu.dot_dimension_numbers<[1], [0], [0], [1], [0, 0, 1, 1], [], []>} : vector<16x16xbf16>, vector<16x256xbf16>, vector<16x256xf32> -> vector<16x256xf32>
    %118 = arith.addf %106, %117 : vector<16x256xf32>
    %c0_52 = arith.constant 0 : index
    %c0_53 = arith.constant 0 : index
    %c0_54 = arith.constant 0 : index
    %119 = vector.load %arg5[%c0_52, %c0_53, %c0_54] : memref<4x16x1xf32, #tpu.memory_space<vmem>>, vector<1x16x1xf32>
    %120 = vector.shape_cast %119 : vector<1x16x1xf32> to vector<16x1xf32>
    %121 = vector.broadcast %120 : vector<16x1xf32> to vector<16x256xf32>
    %122 = arith.addf %118, %121 : vector<16x256xf32>
    %cst_55 = arith.constant 0.000000e+00 : f32
    %123 = vector.broadcast %cst_55 : f32 to vector<16x256xf32>
    %124 = arith.maximumf %122, %123 : vector<16x256xf32>
    %125 = arith.truncf %124 : vector<16x256xf32> to vector<16x256xbf16>
    %c0_56 = arith.constant 0 : index
    %c0_57 = arith.constant 0 : index
    %c0_58 = arith.constant 0 : index
    %126 = vector.load %arg6[%c0_56, %c0_57, %c0_58] : memref<4x32x16xbf16, #tpu.memory_space<vmem>>, vector<1x32x16xbf16>
    %127 = vector.shape_cast %126 : vector<1x32x16xbf16> to vector<32x16xbf16>
    %cst_59 = arith.constant dense<0.000000e+00> : vector<32x256xf32>
    %128 = tpu.matmul %127, %125, %cst_59 {dimension_numbers = #tpu.dot_dimension_numbers<[1], [0], [0], [1], [0, 0, 1, 1], [], []>} : vector<32x16xbf16>, vector<16x256xbf16>, vector<32x256xf32> -> vector<32x256xf32>
    %129 = arith.addf %13, %128 : vector<32x256xf32>
    %130 = vector.extract_strided_slice %16 {offsets = [0, 282], sizes = [16, 256], strides = [1, 1]} : vector<16x1024xbf16> to vector<16x256xbf16>
    %c6_i32 = arith.constant 6 : i32
    %131 = vector.broadcast %c6_i32 : i32 to vector<1x256xi32>
    %132 = arith.cmpi sge, %33, %131 : vector<1x256xi32>
    %c0_i32_60 = arith.constant 0 : i32
    %133 = arith.sitofp %c0_i32_60 : i32 to bf16
    %134 = vector.shape_cast %132 : vector<1x256xi1> to vector<1x256xi1>
    %135 = vector.broadcast %134 : vector<1x256xi1> to vector<16x256xi1>
    %136 = vector.broadcast %133 : bf16 to vector<16x256xbf16>
    %137 = arith.select %135, %130, %136 : vector<16x256xi1>, vector<16x256xbf16>
    %c9 = arith.constant 9 : index
    %c0_61 = arith.constant 0 : index
    %c0_62 = arith.constant 0 : index
    %138 = vector.load %arg4[%c9, %c0_61, %c0_62] : memref<36x16x16xbf16, #tpu.memory_space<vmem>>, vector<1x16x16xbf16>
    %139 = vector.shape_cast %138 : vector<1x16x16xbf16> to vector<16x16xbf16>
    %cst_63 = arith.constant dense<0.000000e+00> : vector<16x256xf32>
    %140 = tpu.matmul %139, %137, %cst_63 {dimension_numbers = #tpu.dot_dimension_numbers<[1], [0], [0], [1], [0, 0, 1, 1], [], []>} : vector<16x16xbf16>, vector<16x256xbf16>, vector<16x256xf32> -> vector<16x256xf32>
    %141 = vector.extract_strided_slice %16 {offsets = [0, 288], sizes = [16, 256], strides = [1, 1]} : vector<16x1024xbf16> to vector<16x256xbf16>
    %c10 = arith.constant 10 : index
    %c0_64 = arith.constant 0 : index
    %c0_65 = arith.constant 0 : index
    %142 = vector.load %arg4[%c10, %c0_64, %c0_65] : memref<36x16x16xbf16, #tpu.memory_space<vmem>>, vector<1x16x16xbf16>
    %143 = vector.shape_cast %142 : vector<1x16x16xbf16> to vector<16x16xbf16>
    %cst_66 = arith.constant dense<0.000000e+00> : vector<16x256xf32>
    %144 = tpu.matmul %143, %141, %cst_66 {dimension_numbers = #tpu.dot_dimension_numbers<[1], [0], [0], [1], [0, 0, 1, 1], [], []>} : vector<16x16xbf16>, vector<16x256xbf16>, vector<16x256xf32> -> vector<16x256xf32>
    %145 = arith.addf %140, %144 : vector<16x256xf32>
    %146 = vector.extract_strided_slice %16 {offsets = [0, 294], sizes = [16, 256], strides = [1, 1]} : vector<16x1024xbf16> to vector<16x256xbf16>
    %c10_i32 = arith.constant 10 : i32
    %147 = vector.broadcast %c10_i32 : i32 to vector<1x256xi32>
    %148 = arith.cmpi slt, %33, %147 : vector<1x256xi32>
    %c0_i32_67 = arith.constant 0 : i32
    %149 = arith.sitofp %c0_i32_67 : i32 to bf16
    %150 = vector.shape_cast %148 : vector<1x256xi1> to vector<1x256xi1>
    %151 = vector.broadcast %150 : vector<1x256xi1> to vector<16x256xi1>
    %152 = vector.broadcast %149 : bf16 to vector<16x256xbf16>
    %153 = arith.select %151, %146, %152 : vector<16x256xi1>, vector<16x256xbf16>
    %c11 = arith.constant 11 : index
    %c0_68 = arith.constant 0 : index
    %c0_69 = arith.constant 0 : index
    %154 = vector.load %arg4[%c11, %c0_68, %c0_69] : memref<36x16x16xbf16, #tpu.memory_space<vmem>>, vector<1x16x16xbf16>
    %155 = vector.shape_cast %154 : vector<1x16x16xbf16> to vector<16x16xbf16>
    %cst_70 = arith.constant dense<0.000000e+00> : vector<16x256xf32>
    %156 = tpu.matmul %155, %153, %cst_70 {dimension_numbers = #tpu.dot_dimension_numbers<[1], [0], [0], [1], [0, 0, 1, 1], [], []>} : vector<16x16xbf16>, vector<16x256xbf16>, vector<16x256xf32> -> vector<16x256xf32>
    %157 = arith.addf %145, %156 : vector<16x256xf32>
    %158 = vector.extract_strided_slice %16 {offsets = [0, 378], sizes = [16, 256], strides = [1, 1]} : vector<16x1024xbf16> to vector<16x256xbf16>
    %c6_i32_71 = arith.constant 6 : i32
    %159 = vector.broadcast %c6_i32_71 : i32 to vector<1x256xi32>
    %160 = arith.cmpi sge, %33, %159 : vector<1x256xi32>
    %c0_i32_72 = arith.constant 0 : i32
    %161 = arith.sitofp %c0_i32_72 : i32 to bf16
    %162 = vector.shape_cast %160 : vector<1x256xi1> to vector<1x256xi1>
    %163 = vector.broadcast %162 : vector<1x256xi1> to vector<16x256xi1>
    %164 = vector.broadcast %161 : bf16 to vector<16x256xbf16>
    %165 = arith.select %163, %158, %164 : vector<16x256xi1>, vector<16x256xbf16>
    %c12 = arith.constant 12 : index
    %c0_73 = arith.constant 0 : index
    %c0_74 = arith.constant 0 : index
    %166 = vector.load %arg4[%c12, %c0_73, %c0_74] : memref<36x16x16xbf16, #tpu.memory_space<vmem>>, vector<1x16x16xbf16>
    %167 = vector.shape_cast %166 : vector<1x16x16xbf16> to vector<16x16xbf16>
    %cst_75 = arith.constant dense<0.000000e+00> : vector<16x256xf32>
    %168 = tpu.matmul %167, %165, %cst_75 {dimension_numbers = #tpu.dot_dimension_numbers<[1], [0], [0], [1], [0, 0, 1, 1], [], []>} : vector<16x16xbf16>, vector<16x256xbf16>, vector<16x256xf32> -> vector<16x256xf32>
    %169 = arith.addf %157, %168 : vector<16x256xf32>
    %c13 = arith.constant 13 : index
    %c0_76 = arith.constant 0 : index
    %c0_77 = arith.constant 0 : index
    %170 = vector.load %arg4[%c13, %c0_76, %c0_77] : memref<36x16x16xbf16, #tpu.memory_space<vmem>>, vector<1x16x16xbf16>
    %171 = vector.shape_cast %170 : vector<1x16x16xbf16> to vector<16x16xbf16>
    %cst_78 = arith.constant dense<0.000000e+00> : vector<16x256xf32>
    %172 = tpu.matmul %171, %14, %cst_78 {dimension_numbers = #tpu.dot_dimension_numbers<[1], [0], [0], [1], [0, 0, 1, 1], [], []>} : vector<16x16xbf16>, vector<16x256xbf16>, vector<16x256xf32> -> vector<16x256xf32>
    %173 = arith.addf %169, %172 : vector<16x256xf32>
    %174 = vector.extract_strided_slice %16 {offsets = [0, 390], sizes = [16, 256], strides = [1, 1]} : vector<16x1024xbf16> to vector<16x256xbf16>
    %c10_i32_79 = arith.constant 10 : i32
    %175 = vector.broadcast %c10_i32_79 : i32 to vector<1x256xi32>
    %176 = arith.cmpi slt, %33, %175 : vector<1x256xi32>
    %c0_i32_80 = arith.constant 0 : i32
    %177 = arith.sitofp %c0_i32_80 : i32 to bf16
    %178 = vector.shape_cast %176 : vector<1x256xi1> to vector<1x256xi1>
    %179 = vector.broadcast %178 : vector<1x256xi1> to vector<16x256xi1>
    %180 = vector.broadcast %177 : bf16 to vector<16x256xbf16>
    %181 = arith.select %179, %174, %180 : vector<16x256xi1>, vector<16x256xbf16>
    %c14 = arith.constant 14 : index
    %c0_81 = arith.constant 0 : index
    %c0_82 = arith.constant 0 : index
    %182 = vector.load %arg4[%c14, %c0_81, %c0_82] : memref<36x16x16xbf16, #tpu.memory_space<vmem>>, vector<1x16x16xbf16>
    %183 = vector.shape_cast %182 : vector<1x16x16xbf16> to vector<16x16xbf16>
    %cst_83 = arith.constant dense<0.000000e+00> : vector<16x256xf32>
    %184 = tpu.matmul %183, %181, %cst_83 {dimension_numbers = #tpu.dot_dimension_numbers<[1], [0], [0], [1], [0, 0, 1, 1], [], []>} : vector<16x16xbf16>, vector<16x256xbf16>, vector<16x256xf32> -> vector<16x256xf32>
    %185 = arith.addf %173, %184 : vector<16x256xf32>
    %186 = vector.extract_strided_slice %16 {offsets = [0, 474], sizes = [16, 256], strides = [1, 1]} : vector<16x1024xbf16> to vector<16x256xbf16>
    %c6_i32_84 = arith.constant 6 : i32
    %187 = vector.broadcast %c6_i32_84 : i32 to vector<1x256xi32>
    %188 = arith.cmpi sge, %33, %187 : vector<1x256xi32>
    %c0_i32_85 = arith.constant 0 : i32
    %189 = arith.sitofp %c0_i32_85 : i32 to bf16
    %190 = vector.shape_cast %188 : vector<1x256xi1> to vector<1x256xi1>
    %191 = vector.broadcast %190 : vector<1x256xi1> to vector<16x256xi1>
    %192 = vector.broadcast %189 : bf16 to vector<16x256xbf16>
    %193 = arith.select %191, %186, %192 : vector<16x256xi1>, vector<16x256xbf16>
    %c15 = arith.constant 15 : index
    %c0_86 = arith.constant 0 : index
    %c0_87 = arith.constant 0 : index
    %194 = vector.load %arg4[%c15, %c0_86, %c0_87] : memref<36x16x16xbf16, #tpu.memory_space<vmem>>, vector<1x16x16xbf16>
    %195 = vector.shape_cast %194 : vector<1x16x16xbf16> to vector<16x16xbf16>
    %cst_88 = arith.constant dense<0.000000e+00> : vector<16x256xf32>
    %196 = tpu.matmul %195, %193, %cst_88 {dimension_numbers = #tpu.dot_dimension_numbers<[1], [0], [0], [1], [0, 0, 1, 1], [], []>} : vector<16x16xbf16>, vector<16x256xbf16>, vector<16x256xf32> -> vector<16x256xf32>
    %197 = arith.addf %185, %196 : vector<16x256xf32>
    %198 = vector.extract_strided_slice %16 {offsets = [0, 480], sizes = [16, 256], strides = [1, 1]} : vector<16x1024xbf16> to vector<16x256xbf16>
    %c16 = arith.constant 16 : index
    %c0_89 = arith.constant 0 : index
    %c0_90 = arith.constant 0 : index
    %199 = vector.load %arg4[%c16, %c0_89, %c0_90] : memref<36x16x16xbf16, #tpu.memory_space<vmem>>, vector<1x16x16xbf16>
    %200 = vector.shape_cast %199 : vector<1x16x16xbf16> to vector<16x16xbf16>
    %cst_91 = arith.constant dense<0.000000e+00> : vector<16x256xf32>
    %201 = tpu.matmul %200, %198, %cst_91 {dimension_numbers = #tpu.dot_dimension_numbers<[1], [0], [0], [1], [0, 0, 1, 1], [], []>} : vector<16x16xbf16>, vector<16x256xbf16>, vector<16x256xf32> -> vector<16x256xf32>
    %202 = arith.addf %197, %201 : vector<16x256xf32>
    %203 = vector.extract_strided_slice %16 {offsets = [0, 486], sizes = [16, 256], strides = [1, 1]} : vector<16x1024xbf16> to vector<16x256xbf16>
    %c10_i32_92 = arith.constant 10 : i32
    %204 = vector.broadcast %c10_i32_92 : i32 to vector<1x256xi32>
    %205 = arith.cmpi slt, %33, %204 : vector<1x256xi32>
    %c0_i32_93 = arith.constant 0 : i32
    %206 = arith.sitofp %c0_i32_93 : i32 to bf16
    %207 = vector.shape_cast %205 : vector<1x256xi1> to vector<1x256xi1>
    %208 = vector.broadcast %207 : vector<1x256xi1> to vector<16x256xi1>
    %209 = vector.broadcast %206 : bf16 to vector<16x256xbf16>
    %210 = arith.select %208, %203, %209 : vector<16x256xi1>, vector<16x256xbf16>
    %c17 = arith.constant 17 : index
    %c0_94 = arith.constant 0 : index
    %c0_95 = arith.constant 0 : index
    %211 = vector.load %arg4[%c17, %c0_94, %c0_95] : memref<36x16x16xbf16, #tpu.memory_space<vmem>>, vector<1x16x16xbf16>
    %212 = vector.shape_cast %211 : vector<1x16x16xbf16> to vector<16x16xbf16>
    %cst_96 = arith.constant dense<0.000000e+00> : vector<16x256xf32>
    %213 = tpu.matmul %212, %210, %cst_96 {dimension_numbers = #tpu.dot_dimension_numbers<[1], [0], [0], [1], [0, 0, 1, 1], [], []>} : vector<16x16xbf16>, vector<16x256xbf16>, vector<16x256xf32> -> vector<16x256xf32>
    %214 = arith.addf %202, %213 : vector<16x256xf32>
    %c1_97 = arith.constant 1 : index
    %c0_98 = arith.constant 0 : index
    %c0_99 = arith.constant 0 : index
    %215 = vector.load %arg5[%c1_97, %c0_98, %c0_99] : memref<4x16x1xf32, #tpu.memory_space<vmem>>, vector<1x16x1xf32>
    %216 = vector.shape_cast %215 : vector<1x16x1xf32> to vector<16x1xf32>
    %217 = vector.broadcast %216 : vector<16x1xf32> to vector<16x256xf32>
    %218 = arith.addf %214, %217 : vector<16x256xf32>
    %cst_100 = arith.constant 0.000000e+00 : f32
    %219 = vector.broadcast %cst_100 : f32 to vector<16x256xf32>
    %220 = arith.maximumf %218, %219 : vector<16x256xf32>
    %221 = arith.truncf %220 : vector<16x256xf32> to vector<16x256xbf16>
    %c1_101 = arith.constant 1 : index
    %c0_102 = arith.constant 0 : index
    %c0_103 = arith.constant 0 : index
    %222 = vector.load %arg6[%c1_101, %c0_102, %c0_103] : memref<4x32x16xbf16, #tpu.memory_space<vmem>>, vector<1x32x16xbf16>
    %223 = vector.shape_cast %222 : vector<1x32x16xbf16> to vector<32x16xbf16>
    %cst_104 = arith.constant dense<0.000000e+00> : vector<32x256xf32>
    %224 = tpu.matmul %223, %221, %cst_104 {dimension_numbers = #tpu.dot_dimension_numbers<[1], [0], [0], [1], [0, 0, 1, 1], [], []>} : vector<32x16xbf16>, vector<16x256xbf16>, vector<32x256xf32> -> vector<32x256xf32>
    %225 = arith.addf %129, %224 : vector<32x256xf32>
    %226 = vector.extract_strided_slice %16 {offsets = [0, 180], sizes = [16, 256], strides = [1, 1]} : vector<16x1024xbf16> to vector<16x256xbf16>
    %c12_i32 = arith.constant 12 : i32
    %227 = vector.broadcast %c12_i32 : i32 to vector<1x256xi32>
    %228 = arith.cmpi sge, %33, %227 : vector<1x256xi32>
    %c0_i32_105 = arith.constant 0 : i32
    %229 = arith.sitofp %c0_i32_105 : i32 to bf16
    %230 = vector.shape_cast %228 : vector<1x256xi1> to vector<1x256xi1>
    %231 = vector.broadcast %230 : vector<1x256xi1> to vector<16x256xi1>
    %232 = vector.broadcast %229 : bf16 to vector<16x256xbf16>
    %233 = arith.select %231, %226, %232 : vector<16x256xi1>, vector<16x256xbf16>
    %c18 = arith.constant 18 : index
    %c0_106 = arith.constant 0 : index
    %c0_107 = arith.constant 0 : index
    %234 = vector.load %arg4[%c18, %c0_106, %c0_107] : memref<36x16x16xbf16, #tpu.memory_space<vmem>>, vector<1x16x16xbf16>
    %235 = vector.shape_cast %234 : vector<1x16x16xbf16> to vector<16x16xbf16>
    %cst_108 = arith.constant dense<0.000000e+00> : vector<16x256xf32>
    %236 = tpu.matmul %235, %233, %cst_108 {dimension_numbers = #tpu.dot_dimension_numbers<[1], [0], [0], [1], [0, 0, 1, 1], [], []>} : vector<16x16xbf16>, vector<16x256xbf16>, vector<16x256xf32> -> vector<16x256xf32>
    %237 = vector.extract_strided_slice %16 {offsets = [0, 192], sizes = [16, 256], strides = [1, 1]} : vector<16x1024xbf16> to vector<16x256xbf16>
    %c19 = arith.constant 19 : index
    %c0_109 = arith.constant 0 : index
    %c0_110 = arith.constant 0 : index
    %238 = vector.load %arg4[%c19, %c0_109, %c0_110] : memref<36x16x16xbf16, #tpu.memory_space<vmem>>, vector<1x16x16xbf16>
    %239 = vector.shape_cast %238 : vector<1x16x16xbf16> to vector<16x16xbf16>
    %cst_111 = arith.constant dense<0.000000e+00> : vector<16x256xf32>
    %240 = tpu.matmul %239, %237, %cst_111 {dimension_numbers = #tpu.dot_dimension_numbers<[1], [0], [0], [1], [0, 0, 1, 1], [], []>} : vector<16x16xbf16>, vector<16x256xbf16>, vector<16x256xf32> -> vector<16x256xf32>
    %241 = arith.addf %236, %240 : vector<16x256xf32>
    %242 = vector.extract_strided_slice %16 {offsets = [0, 204], sizes = [16, 256], strides = [1, 1]} : vector<16x1024xbf16> to vector<16x256xbf16>
    %c4_i32 = arith.constant 4 : i32
    %243 = vector.broadcast %c4_i32 : i32 to vector<1x256xi32>
    %244 = arith.cmpi slt, %33, %243 : vector<1x256xi32>
    %c0_i32_112 = arith.constant 0 : i32
    %245 = arith.sitofp %c0_i32_112 : i32 to bf16
    %246 = vector.shape_cast %244 : vector<1x256xi1> to vector<1x256xi1>
    %247 = vector.broadcast %246 : vector<1x256xi1> to vector<16x256xi1>
    %248 = vector.broadcast %245 : bf16 to vector<16x256xbf16>
    %249 = arith.select %247, %242, %248 : vector<16x256xi1>, vector<16x256xbf16>
    %c20 = arith.constant 20 : index
    %c0_113 = arith.constant 0 : index
    %c0_114 = arith.constant 0 : index
    %250 = vector.load %arg4[%c20, %c0_113, %c0_114] : memref<36x16x16xbf16, #tpu.memory_space<vmem>>, vector<1x16x16xbf16>
    %251 = vector.shape_cast %250 : vector<1x16x16xbf16> to vector<16x16xbf16>
    %cst_115 = arith.constant dense<0.000000e+00> : vector<16x256xf32>
    %252 = tpu.matmul %251, %249, %cst_115 {dimension_numbers = #tpu.dot_dimension_numbers<[1], [0], [0], [1], [0, 0, 1, 1], [], []>} : vector<16x16xbf16>, vector<16x256xbf16>, vector<16x256xf32> -> vector<16x256xf32>
    %253 = arith.addf %241, %252 : vector<16x256xf32>
    %254 = vector.extract_strided_slice %16 {offsets = [0, 372], sizes = [16, 256], strides = [1, 1]} : vector<16x1024xbf16> to vector<16x256xbf16>
    %c12_i32_116 = arith.constant 12 : i32
    %255 = vector.broadcast %c12_i32_116 : i32 to vector<1x256xi32>
    %256 = arith.cmpi sge, %33, %255 : vector<1x256xi32>
    %c0_i32_117 = arith.constant 0 : i32
    %257 = arith.sitofp %c0_i32_117 : i32 to bf16
    %258 = vector.shape_cast %256 : vector<1x256xi1> to vector<1x256xi1>
    %259 = vector.broadcast %258 : vector<1x256xi1> to vector<16x256xi1>
    %260 = vector.broadcast %257 : bf16 to vector<16x256xbf16>
    %261 = arith.select %259, %254, %260 : vector<16x256xi1>, vector<16x256xbf16>
    %c21 = arith.constant 21 : index
    %c0_118 = arith.constant 0 : index
    %c0_119 = arith.constant 0 : index
    %262 = vector.load %arg4[%c21, %c0_118, %c0_119] : memref<36x16x16xbf16, #tpu.memory_space<vmem>>, vector<1x16x16xbf16>
    %263 = vector.shape_cast %262 : vector<1x16x16xbf16> to vector<16x16xbf16>
    %cst_120 = arith.constant dense<0.000000e+00> : vector<16x256xf32>
    %264 = tpu.matmul %263, %261, %cst_120 {dimension_numbers = #tpu.dot_dimension_numbers<[1], [0], [0], [1], [0, 0, 1, 1], [], []>} : vector<16x16xbf16>, vector<16x256xbf16>, vector<16x256xf32> -> vector<16x256xf32>
    %265 = arith.addf %253, %264 : vector<16x256xf32>
    %c22 = arith.constant 22 : index
    %c0_121 = arith.constant 0 : index
    %c0_122 = arith.constant 0 : index
    %266 = vector.load %arg4[%c22, %c0_121, %c0_122] : memref<36x16x16xbf16, #tpu.memory_space<vmem>>, vector<1x16x16xbf16>
    %267 = vector.shape_cast %266 : vector<1x16x16xbf16> to vector<16x16xbf16>
    %cst_123 = arith.constant dense<0.000000e+00> : vector<16x256xf32>
    %268 = tpu.matmul %267, %14, %cst_123 {dimension_numbers = #tpu.dot_dimension_numbers<[1], [0], [0], [1], [0, 0, 1, 1], [], []>} : vector<16x16xbf16>, vector<16x256xbf16>, vector<16x256xf32> -> vector<16x256xf32>
    %269 = arith.addf %265, %268 : vector<16x256xf32>
    %270 = vector.extract_strided_slice %16 {offsets = [0, 396], sizes = [16, 256], strides = [1, 1]} : vector<16x1024xbf16> to vector<16x256xbf16>
    %c4_i32_124 = arith.constant 4 : i32
    %271 = vector.broadcast %c4_i32_124 : i32 to vector<1x256xi32>
    %272 = arith.cmpi slt, %33, %271 : vector<1x256xi32>
    %c0_i32_125 = arith.constant 0 : i32
    %273 = arith.sitofp %c0_i32_125 : i32 to bf16
    %274 = vector.shape_cast %272 : vector<1x256xi1> to vector<1x256xi1>
    %275 = vector.broadcast %274 : vector<1x256xi1> to vector<16x256xi1>
    %276 = vector.broadcast %273 : bf16 to vector<16x256xbf16>
    %277 = arith.select %275, %270, %276 : vector<16x256xi1>, vector<16x256xbf16>
    %c23 = arith.constant 23 : index
    %c0_126 = arith.constant 0 : index
    %c0_127 = arith.constant 0 : index
    %278 = vector.load %arg4[%c23, %c0_126, %c0_127] : memref<36x16x16xbf16, #tpu.memory_space<vmem>>, vector<1x16x16xbf16>
    %279 = vector.shape_cast %278 : vector<1x16x16xbf16> to vector<16x16xbf16>
    %cst_128 = arith.constant dense<0.000000e+00> : vector<16x256xf32>
    %280 = tpu.matmul %279, %277, %cst_128 {dimension_numbers = #tpu.dot_dimension_numbers<[1], [0], [0], [1], [0, 0, 1, 1], [], []>} : vector<16x16xbf16>, vector<16x256xbf16>, vector<16x256xf32> -> vector<16x256xf32>
    %281 = arith.addf %269, %280 : vector<16x256xf32>
    %282 = vector.extract_strided_slice %16 {offsets = [0, 564], sizes = [16, 256], strides = [1, 1]} : vector<16x1024xbf16> to vector<16x256xbf16>
    %c12_i32_129 = arith.constant 12 : i32
    %283 = vector.broadcast %c12_i32_129 : i32 to vector<1x256xi32>
    %284 = arith.cmpi sge, %33, %283 : vector<1x256xi32>
    %c0_i32_130 = arith.constant 0 : i32
    %285 = arith.sitofp %c0_i32_130 : i32 to bf16
    %286 = vector.shape_cast %284 : vector<1x256xi1> to vector<1x256xi1>
    %287 = vector.broadcast %286 : vector<1x256xi1> to vector<16x256xi1>
    %288 = vector.broadcast %285 : bf16 to vector<16x256xbf16>
    %289 = arith.select %287, %282, %288 : vector<16x256xi1>, vector<16x256xbf16>
    %c24 = arith.constant 24 : index
    %c0_131 = arith.constant 0 : index
    %c0_132 = arith.constant 0 : index
    %290 = vector.load %arg4[%c24, %c0_131, %c0_132] : memref<36x16x16xbf16, #tpu.memory_space<vmem>>, vector<1x16x16xbf16>
    %291 = vector.shape_cast %290 : vector<1x16x16xbf16> to vector<16x16xbf16>
    %cst_133 = arith.constant dense<0.000000e+00> : vector<16x256xf32>
    %292 = tpu.matmul %291, %289, %cst_133 {dimension_numbers = #tpu.dot_dimension_numbers<[1], [0], [0], [1], [0, 0, 1, 1], [], []>} : vector<16x16xbf16>, vector<16x256xbf16>, vector<16x256xf32> -> vector<16x256xf32>
    %293 = arith.addf %281, %292 : vector<16x256xf32>
    %294 = vector.extract_strided_slice %16 {offsets = [0, 576], sizes = [16, 256], strides = [1, 1]} : vector<16x1024xbf16> to vector<16x256xbf16>
    %c25 = arith.constant 25 : index
    %c0_134 = arith.constant 0 : index
    %c0_135 = arith.constant 0 : index
    %295 = vector.load %arg4[%c25, %c0_134, %c0_135] : memref<36x16x16xbf16, #tpu.memory_space<vmem>>, vector<1x16x16xbf16>
    %296 = vector.shape_cast %295 : vector<1x16x16xbf16> to vector<16x16xbf16>
    %cst_136 = arith.constant dense<0.000000e+00> : vector<16x256xf32>
    %297 = tpu.matmul %296, %294, %cst_136 {dimension_numbers = #tpu.dot_dimension_numbers<[1], [0], [0], [1], [0, 0, 1, 1], [], []>} : vector<16x16xbf16>, vector<16x256xbf16>, vector<16x256xf32> -> vector<16x256xf32>
    %298 = arith.addf %293, %297 : vector<16x256xf32>
    %299 = vector.extract_strided_slice %16 {offsets = [0, 588], sizes = [16, 256], strides = [1, 1]} : vector<16x1024xbf16> to vector<16x256xbf16>
    %c4_i32_137 = arith.constant 4 : i32
    %300 = vector.broadcast %c4_i32_137 : i32 to vector<1x256xi32>
    %301 = arith.cmpi slt, %33, %300 : vector<1x256xi32>
    %c0_i32_138 = arith.constant 0 : i32
    %302 = arith.sitofp %c0_i32_138 : i32 to bf16
    %303 = vector.shape_cast %301 : vector<1x256xi1> to vector<1x256xi1>
    %304 = vector.broadcast %303 : vector<1x256xi1> to vector<16x256xi1>
    %305 = vector.broadcast %302 : bf16 to vector<16x256xbf16>
    %306 = arith.select %304, %299, %305 : vector<16x256xi1>, vector<16x256xbf16>
    %c26 = arith.constant 26 : index
    %c0_139 = arith.constant 0 : index
    %c0_140 = arith.constant 0 : index
    %307 = vector.load %arg4[%c26, %c0_139, %c0_140] : memref<36x16x16xbf16, #tpu.memory_space<vmem>>, vector<1x16x16xbf16>
    %308 = vector.shape_cast %307 : vector<1x16x16xbf16> to vector<16x16xbf16>
    %cst_141 = arith.constant dense<0.000000e+00> : vector<16x256xf32>
    %309 = tpu.matmul %308, %306, %cst_141 {dimension_numbers = #tpu.dot_dimension_numbers<[1], [0], [0], [1], [0, 0, 1, 1], [], []>} : vector<16x16xbf16>, vector<16x256xbf16>, vector<16x256xf32> -> vector<16x256xf32>
    %310 = arith.addf %298, %309 : vector<16x256xf32>
    %c2_142 = arith.constant 2 : index
    %c0_143 = arith.constant 0 : index
    %c0_144 = arith.constant 0 : index
    %311 = vector.load %arg5[%c2_142, %c0_143, %c0_144] : memref<4x16x1xf32, #tpu.memory_space<vmem>>, vector<1x16x1xf32>
    %312 = vector.shape_cast %311 : vector<1x16x1xf32> to vector<16x1xf32>
    %313 = vector.broadcast %312 : vector<16x1xf32> to vector<16x256xf32>
    %314 = arith.addf %310, %313 : vector<16x256xf32>
    %cst_145 = arith.constant 0.000000e+00 : f32
    %315 = vector.broadcast %cst_145 : f32 to vector<16x256xf32>
    %316 = arith.maximumf %314, %315 : vector<16x256xf32>
    %317 = arith.truncf %316 : vector<16x256xf32> to vector<16x256xbf16>
    %c2_146 = arith.constant 2 : index
    %c0_147 = arith.constant 0 : index
    %c0_148 = arith.constant 0 : index
    %318 = vector.load %arg6[%c2_146, %c0_147, %c0_148] : memref<4x32x16xbf16, #tpu.memory_space<vmem>>, vector<1x32x16xbf16>
    %319 = vector.shape_cast %318 : vector<1x32x16xbf16> to vector<32x16xbf16>
    %cst_149 = arith.constant dense<0.000000e+00> : vector<32x256xf32>
    %320 = tpu.matmul %319, %317, %cst_149 {dimension_numbers = #tpu.dot_dimension_numbers<[1], [0], [0], [1], [0, 0, 1, 1], [], []>} : vector<32x16xbf16>, vector<16x256xbf16>, vector<32x256xf32> -> vector<32x256xf32>
    %321 = arith.addf %225, %320 : vector<32x256xf32>
    %c31 = arith.constant 31 : index
    %c0_150 = arith.constant 0 : index
    %c0_151 = arith.constant 0 : index
    %322 = vector.load %arg4[%c31, %c0_150, %c0_151] : memref<36x16x16xbf16, #tpu.memory_space<vmem>>, vector<1x16x16xbf16>
    %323 = vector.shape_cast %322 : vector<1x16x16xbf16> to vector<16x16xbf16>
    %cst_152 = arith.constant dense<0.000000e+00> : vector<16x256xf32>
    %324 = tpu.matmul %323, %14, %cst_152 {dimension_numbers = #tpu.dot_dimension_numbers<[1], [0], [0], [1], [0, 0, 1, 1], [], []>} : vector<16x16xbf16>, vector<16x256xbf16>, vector<16x256xf32> -> vector<16x256xf32>
    %c3_153 = arith.constant 3 : index
    %c0_154 = arith.constant 0 : index
    %c0_155 = arith.constant 0 : index
    %325 = vector.load %arg5[%c3_153, %c0_154, %c0_155] : memref<4x16x1xf32, #tpu.memory_space<vmem>>, vector<1x16x1xf32>
    %326 = vector.shape_cast %325 : vector<1x16x1xf32> to vector<16x1xf32>
    %327 = vector.broadcast %326 : vector<16x1xf32> to vector<16x256xf32>
    %328 = arith.addf %324, %327 : vector<16x256xf32>
    %cst_156 = arith.constant 0.000000e+00 : f32
    %329 = vector.broadcast %cst_156 : f32 to vector<16x256xf32>
    %330 = arith.maximumf %328, %329 : vector<16x256xf32>
    %331 = arith.truncf %330 : vector<16x256xf32> to vector<16x256xbf16>
    %c3_157 = arith.constant 3 : index
    %c0_158 = arith.constant 0 : index
    %c0_159 = arith.constant 0 : index
    %332 = vector.load %arg6[%c3_157, %c0_158, %c0_159] : memref<4x32x16xbf16, #tpu.memory_space<vmem>>, vector<1x32x16xbf16>
    %333 = vector.shape_cast %332 : vector<1x32x16xbf16> to vector<32x16xbf16>
    %cst_160 = arith.constant dense<0.000000e+00> : vector<32x256xf32>
    %334 = tpu.matmul %333, %331, %cst_160 {dimension_numbers = #tpu.dot_dimension_numbers<[1], [0], [0], [1], [0, 0, 1, 1], [], []>} : vector<32x16xbf16>, vector<16x256xbf16>, vector<32x256xf32> -> vector<32x256xf32>
    %335 = arith.addf %321, %334 : vector<32x256xf32>
    %cst_161 = arith.constant 0.000000e+00 : f32
    %336 = vector.broadcast %cst_161 : f32 to vector<32x256xf32>
    %337 = arith.maximumf %335, %336 : vector<32x256xf32>
    %c0_162 = arith.constant 0 : index
    %c0_163 = arith.constant 0 : index
    %c0_164 = arith.constant 0 : index
    %338 = vector.load %arg8[%c0_162, %c0_163, %c0_164] : memref<1x32x256xf32, #tpu.memory_space<vmem>>, vector<1x32x256xf32>
    %339 = vector.shape_cast %338 : vector<1x32x256xf32> to vector<32x256xf32>
    %340 = vector.shape_cast %337 : vector<32x256xf32> to vector<1x32x256xf32>
    tpu.vector_store %arg8[%c0_162, %c0_163, %c0_164], %340 {strides = array<i32>} : memref<1x32x256xf32, #tpu.memory_space<vmem>>, vector<1x32x256xf32>,
    return
  }
  func.func @transform_0(%arg0: i32) -> (i32, i32, i32) {
    %c0_i32 = arith.constant 0 : i32
    %c0_i32_0 = arith.constant 0 : i32
    %c0_i32_1 = arith.constant 0 : i32
    return %arg0, %c0_i32, %c0_i32_0 : i32, i32, i32
  }
  func.func @transform_1(%arg0: i32) -> (i32, i32) {
    %c0_i32 = arith.constant 0 : i32
    %c0_i32_0 = arith.constant 0 : i32
    %c0_i32_1 = arith.constant 0 : i32
    return %c0_i32, %c0_i32_0 : i32, i32
  }
  func.func @transform_2(%arg0: i32) -> (i32, i32) {
    %c0_i32 = arith.constant 0 : i32
    %c0_i32_0 = arith.constant 0 : i32
    %c0_i32_1 = arith.constant 0 : i32
    return %c0_i32, %c0_i32_0 : i32, i32
  }
  func.func @transform_3(%arg0: i32) -> (i32, i32, i32) {
    %c0_i32 = arith.constant 0 : i32
    %c0_i32_0 = arith.constant 0 : i32
    %c0_i32_1 = arith.constant 0 : i32
    %c0_i32_2 = arith.constant 0 : i32
    return %c0_i32, %c0_i32_0, %c0_i32_1 : i32, i32, i32
  }
  func.func @transform_4(%arg0: i32) -> (i32, i32, i32) {
    %c0_i32 = arith.constant 0 : i32
    %c0_i32_0 = arith.constant 0 : i32
    %c0_i32_1 = arith.constant 0 : i32
    %c0_i32_2 = arith.constant 0 : i32
    return %c0_i32, %c0_i32_0, %c0_i32_1 : i32, i32, i32
  }
  func.func @transform_5(%arg0: i32) -> (i32, i32, i32) {
    %c0_i32 = arith.constant 0 : i32
    %c0_i32_0 = arith.constant 0 : i32
    %c0_i32_1 = arith.constant 0 : i32
    %c0_i32_2 = arith.constant 0 : i32
    return %c0_i32, %c0_i32_0, %c0_i32_1 : i32, i32, i32
  }
  func.func @transform_6(%arg0: i32) -> (i32, i32) {
    %c0_i32 = arith.constant 0 : i32
    %c0_i32_0 = arith.constant 0 : i32
    %c0_i32_1 = arith.constant 0 : i32
    return %c0_i32, %c0_i32_0 : i32, i32
  }
  func.func @transform_7(%arg0: i32) -> (i32, i32, i32) {
    %c0_i32 = arith.constant 0 : i32
    %c0_i32_0 = arith.constant 0 : i32
    %c0_i32_1 = arith.constant 0 : i32
    return %arg0, %c0_i32, %c0_i32_0 : i32, i32, i32
  }
}

</mosaic_0001>

<bundles_post_ra>
// kernel: ablock_forward.1
= control target key start
LH: loop header
LB: loop body
LE: loop exit
PB: predicated region body
PF: predicated region fallthrough
CT: control target
= control target key end

     0   :  { %s3505_s24 = smov 0   ;;  %s4175_s0 = inlined_call_operand.vmem [shape: bf16[2,8,256], index: 0, kind: input, shape index: {}]   ;;  %s4176_s1 = inlined_call_operand.vmem [shape: bf16[48,8], index: 1, kind: input, shape index: {}]   ;;  %s4177_s2 = inlined_call_operand.vmem [shape: f32[16,1], index: 2, kind: input, shape index: {}]   ;;  %s4178_s3 = inlined_call_operand.vmem [shape: bf16[36,16,16], index: 3, kind: input, shape index: {}]   ;;  %s4179_s4 = inlined_call_operand.vmem [shape: f32[4,16,1], index: 4, kind: input, shape index: {}]   ;;  %s4180_s5 = inlined_call_operand.vmem [shape: bf16[4,32,16], index: 5, kind: input, shape index: {}]   ;;  %s4181_s6 = inlined_call_operand.vmem [shape: f32[32,1], index: 6, kind: input, shape index: {}]   ;;  %s4182_s7 = inlined_call_operand.vmem [shape: f32[2,32,256], index: 7, kind: output, shape index: {}]  }
   0x1 LB: > { %s3058_s25 = sadd.s32 4294967295, %s3441_s24   ;;  %p3062_p0 = scmp.ge.s32.totalorder %s3441_s24, 1  ;;  %s3441_s24 = sphi %s3505_s24, %s17_s24  }
   0x2   : > { %p237_p1 = scmp.lt.s32.totalorder %s3441_s24, 3 }
   0x4   : > { %p238_p2 = pnand %p3062_p0, %p237_p1 }
   0x5   : > { %p269_p3 = scmp.lt.s32.totalorder (!%p238_p2), %s3058_s25, 1  ;;  %v443_v0 = vlaneseq (!%p238_p2)  ;;  %v3443_v1 = vmov (!%p238_p2), 0   ;;  %v389_v2 = vld [vmem:[%s4177_s2] sm:$0xff] (!%p238_p2)  ;;  %v390_v5 = vld [vmem:[%s4177_s2 + $0x8] sm:$0xff] (!%p238_p2)  ;;  %vm319_vm0 = vcmask (!%p238_p2), 1043456   ;;  %vm309_vm1 = vcmask (!%p238_p2), 64512  }
   0x6   : > { %241 = sbr.rel (%p238_p2) target bundleno = 1563 (0x61b), region = 48  ;;  %358 = vmatprep.mubr.bf16.mxu0 (!%p238_p2), %v3443_v1  ;;  %3392 = vset.pattern.permute.xlu0 (!%p238_p2), %v3443_v1  ;;  %v3396_v13 = vld [vmem:[%s4176_s1] sm:$0xff] (!%p238_p2)   ;;  %s3444_s13 = smov (!%p238_p2), 111   ;;  %v3397_v22 = vld [vmem:[%s4176_s1 + $0x8] sm:$0xff] (!%p238_p2)   ;;  %v3398_v23 = vld [vmem:[%s4176_s1 + $0x10] sm:$0xff] (!%p238_p2)   ;;  %vm490_vm8 = vcmask (!%p238_p2), 908288  }
   0x7   : > { %393 = vperm.xlu0 (!%p238_p2), %3392, %v389_v2   ;;  %v444_v3 = vand.u32 (!%p238_p2), 127, %v443_v0  ;;  %v479_v4 = vshrl.u32 (!%p238_p2), %v443_v0, 7  ;;  %368 = vmatprep.mubr.bf16.mxu1 (!%p238_p2), %v3443_v1  ;;  %s3445_s14 = smov (!%p238_p2), 113   ;;  %s3446_s15 = smov (!%p238_p2), 127   ;;  %vm651_vm10 = vcmask (!%p238_p2), 924672   ;;  %vm732_vm14 = vcmask (!%p238_p2), 1039360  }
   0x8   : > { %3393 = vset.pattern.permute.xlu1 (!%p238_p2), %v3443_v1  ;;  %s3447_s16 = smov (!%p238_p2), 1   ;;  %s3448_s21 = smov (!%p238_p2), 16  }
   0x9   : > { %v445_v6 = vadd.s32 (!%p238_p2), 128, %v444_v3  ;;  %v3526_v7 = vand.u32 (!%p238_p2), 15, %v444_v3  ;;  %v3534_v10 = vsub.s32 (!%p238_p2), 0, %v479_v4  ;;  %v3544_v15 = vsub.s32 (!%p238_p2), 4, %v479_v4  ;;  %s3449_s22 = smov (!%p238_p2), 15   ;;  %s3450_s23 = smov (!%p238_p2), 17  }
   0xa   : > { %s3451_s26 = smov (!%p238_p2), 112   ;;  %s3452_s27 = smov (!%p238_p2), 26   ;;  %v1174_v3 = vld [vmem:[%s4179_s4 + $0x8] sm:$0xff] (!%p238_p2) }
   0xb   : > { %398 = vperm.xlu0 (!%p238_p2), %3392, %v390_v5   ;;  %v3531_v9 = vand.u32 (!%p238_p2), 15, %v445_v6  ;;  %vm470_vm2 = vcmp.ge.s32.totalorder (!%p238_p2), %v3526_v7, 1  ;;  %vm631_vm3 = vcmp.lt.s32.totalorder (!%p238_p2), %v3526_v7, 15  ;;  %s3453_s28 = smov (!%p238_p2), 38   ;;  %s3454_s29 = smov (!%p238_p2), 52  }
   0xc   : > { %s3455_s9 = smov (!%p238_p2), 122   ;;  %s3457_s11 = smov (!%p238_p2), 6  }
   0xd   : > { %s4184_s25 = smov (!%p269_p3, %s3058_s25), 1  ;;  %vm471_vm4 = vcmp.ge.s32.totalorder %v3531_v9, 1  ;;  %vm632_vm5 = vcmp.lt.s32.totalorder %v3531_v9, 15  ;;  %s3458_s12 = smov 96  }
   0xe   : > { %s3222_s30 = sshll.u32 %s4184_s25, 3  ;;  %vm476_vm6 = vmpackc.low %vm471_vm4, %vm470_vm2  ;;  %vm1276_vm4 = vcmp.ge.s32.totalorder %v3526_v7, 6  ;;  %s3462_s8 = smov 76  }
   0xf   : > { %s273_s10 = scalar_lea.vmem %s4175_s0, %s3222_s30  ;;  %v477_v16 = vsel %vm476_vm6, 65537, %v3443_v1  ;;  %vm637_vm7 = vmpackc.low %vm632_vm5, %vm631_vm3  ;;  %vm1277_vm5 = vcmp.ge.s32.totalorder %v3531_v9, 6  ;;  %s3223_s20 = sshll.u32 %s4184_s25, 6 }
  0x10   : > { %v282_v8 = vld [vmem:[%s273_s10] sm:$0xff]  ;;  %v481_v17 = vrot.slane %v477_v16, %v3534_v10  ;;  %v638_v18 = vsel %vm637_vm7, 65537, %v3443_v1  ;;  %v485_v20 = vrot.slane %v477_v16, %v3544_v15  ;;  %vm1282_vm6 = vmpackc.low %vm1277_vm5, %vm1276_vm4  ;;  %vm1434_vm7 = vcmp.lt.s32.totalorder %v3526_v7, 10  ;;  %s3456_s10 = smov 116   ;;  %v3399_v16 = vld [vmem:[%s4178_s3 + $0x8] sm:$0xff]  }
  0x11   : > { %v3071_v11 = vcombine.high %v282_v8, %v282_v8  ;;  %v3070_v12 = vcombine.low %v282_v8, %v282_v8  ;;  %v3551_v19 = vrot.slane %v638_v18, %v3534_v10  ;;  %v3561_v21 = vrot.slane %v638_v18, %v3544_v15 }
  0x12   : > { %486 = vrot.lane.b32.xlu1 %v481_v17, %s3444_s13  ;;  %v1283_v60 = vsel %vm1282_vm6, 65537, %v3443_v1  ;;  %vm515_vm4 = vcmask 130048   ;;  %vm673_vm5 = vcmask 121856  }
  0x13   : > { %3072 = vmatprep.subr.msk.bf16.mxu0 %vm319_vm0, %v3071_v11  ;;  %v321_v14 = vsel %vm319_vm0, %v3070_v12, 0  ;;  %3224 = vmatprep.subr.msk.bf16.mxu1 %vm319_vm0, %v3071_v11  ;;  %vm754_vm0 = vcmask 7168   ;;  %v3628_v61 = vrot.slane %v1283_v60, %v3534_v10  ;;  %v3651_v4 = vrot.slane %v1283_v60, %v3544_v15 }
  0x14   : > { %327 = vmatpush1.bf16.msra.mxu0 %v321_v14  ;;  %3225 = vmatpush1.bf16.msra.mxu1 %v321_v14 }
  0x15   : > { %647 = vrot.lane.b32.xlu0 %v3551_v19, %s3445_s14 }
  0x16   : > { %488 = vrot.lane.b32.xlu1 %v485_v20, %s3444_s13 }
  0x17   : > { %3073 = vmatmul.mubr.msk.bf16.vlgmr.msra.gmra.mrb[0].mxu0 %vm309_vm1, %v3396_v13  ;;  %3074 = vmatmul.mubr.msk.bf16.vlgmr.msra.gmra.mrb[0].mxu1 %vm309_vm1, %v3397_v22 }
  0x18   : > { %1247 = vmatprep.mubr.bf16.mxu0 %v3443_v1  ;;  %378 = vmatprep.mubr.bf16.mxu1 %v3443_v1 }
  0x19   : > { %728 = vrot.lane.b32.xlu0 %v481_v17, %s3446_s15 }
  0x1a   : > { %649 = vrot.lane.b32.xlu1 %v3561_v21, %s3445_s14 }
  0x1d   : > { %867 = vrot.lane.b32.xlu0 %v3551_v19, %s3447_s16 }
  0x1e   : > { %730 = vrot.lane.b32.xlu1 %v485_v20, %s3446_s15 }
  0x1f   : > { %3075 = vmatmul.mubr.msk.bf16.gmra.mrb[4].mxu1 %vm309_vm1, %v3398_v23 }
  0x20   : > { %556 = vmatprep.mubr.bf16.mxu1 %v3443_v1 }
  0x22   : > { %869 = vrot.lane.b32.xlu1 %v3561_v21, %s3447_s16 }
  0x84   : > { %v487_v33 = vpop.permute.xlu1 %486 }
  0x86   : > { %v394_v24 = vpop.permute.xlu0 %393 }
  0x88   : > { %v489_v41 = vpop.permute.xlu1 %488 }
  0x89   : > { %v491_v42 = vsel %vm490_vm8, %v487_v33, %v489_v41  ;;  %vm493_vm11 = vcmp.ne.s16.totalorder %v489_v41, 0 }
  0x8a   : > { %v399_v28 = vpop.permute.xlu0 %398  ;;  %vm492_vm9 = vcmp.ne.s16.totalorder %v491_v42, 0 }
  0x8c   : > { %v650_v44 = vpop.permute.xlu1 %649 }
  0x8d   : > { %vm654_vm13 = vcmp.ne.s16.totalorder %v650_v44, 0 }
  0x8e   : > { %v648_v43 = vpop.permute.xlu0 %647 }
  0x8f   : > { %v652_v46 = vsel %vm651_vm10, %v648_v43, %v650_v44 }
  0x90   : > { %vm653_vm12 = vcmp.ne.s16.totalorder %v652_v46, 0  ;;  %v731_v50 = vpop.permute.xlu1 %730  ;;  %v3402_v46 = vld [vmem:[%s4178_s3 + $0x18] sm:$0xff]  }
  0x91   : > { %vm735_vm1 = vcmp.ne.s16.totalorder %v731_v50, 0 }
  0x92   : > { %v729_v49 = vpop.permute.xlu0 %728 }
  0x93   : > { %v733_v52 = vsel %vm732_vm14, %v729_v49, %v731_v50 }
  0x94   : > { %vm734_vm15 = vcmp.ne.s16.totalorder %v733_v52, 0  ;;  %v870_v54 = vpop.permute.xlu1 %869 }
  0x96   : > { %v868_v53 = vpop.permute.xlu0 %867 }
  0x97   : > { %v871_v56 = vsel %vm754_vm0, %v868_v53, %v870_v54  ;;  %vm872_vm3 = vcmp.ne.s16.totalorder %v868_v53, 0 }
  0x98   : > { %vm873_vm2 = vcmp.ne.s16.totalorder %v871_v56, 0 }
  0xea   : > { %v360_v25 = vpop.f32.mrb[0].mxu0  ;;  %v3762_v54 = vpop.f32.mrb[0].mxu1 }
  0xeb   : > { %v401_v26 = vadd.f32 %v394_v24, %v360_v25  ;;  %v362_v27 = vpop.f32.mrb[1].mxu0 }
  0xec   : > { %v402_v29 = vadd.f32 %v394_v24, %v362_v27  ;;  %v364_v30 = vpop.f32.mrb[2].mxu0  ;;  %v3400_v27 = vld [vmem:[%s4178_s3] sm:$0xff]  }
  0xed   : > { %v403_v31 = vadd.f32 %v399_v28, %v364_v30  ;;  %v366_v32 = vpop.f32.mrb[3].mxu0  ;;  %v405_v35 = vmax.f32 %v401_v26, 0.0 }
  0xee   : > { %v404_v34 = vadd.f32 %v399_v28, %v366_v32  ;;  %v406_v37 = vmax.f32 %v402_v29, 0.0 }
  0xef   : > { %v407_v36 = vmax.f32 %v403_v31, 0.0 }
  0xf0   : > { %v408_v38 = vmax.f32 %v404_v34, 0.0 }
  0xf1   : > { %v3581_v39 = vpack.c.bf16 %v407_v36, %v405_v35 }
  0xf2   : > { %v3583_v40 = vpack.c.bf16 %v408_v38, %v406_v37  ;;  %v3401_v38 = vld [vmem:[%s4178_s3 + $0x10] sm:$0xff]  }
  0xf3   : > { %511 = vrot.lane.b32.xlu0 %v3581_v39, %s3448_s21  ;;  %v494_v45 = vsel %vm492_vm9, %v3581_v39, 0  ;;  %v655_v48 = vsel %vm653_vm12, %v3581_v39, 0  ;;  %v736_v55 = vsel %vm734_vm15, %v3581_v39, 0  ;;  %v874_v59 = vsel %vm872_vm3, %v3581_v39, 0 }
  0xf4   : > { %513 = vrot.lane.b32.xlu1 %v3583_v40, %s3448_s21  ;;  %v495_v47 = vsel %vm493_vm11, %v3583_v40, 0  ;;  %v656_v51 = vsel %vm654_vm13, %v3583_v40, 0  ;;  %v737_v57 = vsel %vm735_vm1, %v3583_v40, 0  ;;  %v875_v58 = vsel %vm873_vm2, %v3583_v40, 0 }
  0xf5   : > { %vm1435_vm9 = vcmp.lt.s32.totalorder %v3531_v9, 10  ;;  %vm2081_vm12 = vcmp.ge.s32.totalorder %v3526_v7, 12  ;;  %vm2082_vm13 = vcmp.ge.s32.totalorder %v3531_v9, 12  ;;  %vm2222_vm1 = vcmp.lt.s32.totalorder %v3526_v7, 4 }
  0xf6   : > { %vm1440_vm11 = vmpackc.low %vm1435_vm9, %vm1434_vm7  ;;  %vm2223_vm2 = vcmp.lt.s32.totalorder %v3531_v9, 4  ;;  %vm580_vm7 = vcmask 138240  }
  0xf7   : > { %509 = vrot.lane.b32.xlu0 %v3443_v1, %s3448_s21  ;;  %v3631_v62 = vsel %vm1440_vm11, 65537, %v3443_v1  ;;  %vm2087_vm15 = vmpackc.low %vm2082_vm13, %vm2081_vm12  ;;  %s3461_s21 = smov 64  }
  0xf8   : > { %946 = vrot.lane.b32.xlu1 %v481_v17, %s3449_s22  ;;  %v3637_v63 = vrot.slane %v3631_v62, %v3534_v10  ;;  %v2088_v0 = vsel %vm2087_vm15, 65537, %v3443_v1  ;;  %vm2228_vm3 = vmpackc.low %vm2223_vm2, %vm2222_vm1  ;;  %v3721_v44 = vrot.slane %v3631_v62, %v3544_v15  ;;  %vm1454_vm15 = vcmask 310272  }
  0xf9   : > { %v3643_v2 = vrot.slane %v2088_v0, %v3544_v15  ;;  %v3656_v5 = vrot.slane %v2088_v0, %v3534_v10  ;;  %v3669_v6 = vsel %vm2228_vm3, 65537, %v3443_v1  ;;  %vm1535_vm3 = vcmask 998400  }
  0xfa   : > { %v3675_v7 = vrot.slane %v3669_v6, %v3534_v10  ;;  %v3739_v50 = vrot.slane %v3669_v6, %v3544_v15  ;;  %v3404_v15 = vld [vmem:[%s4178_s3 + $0x28] sm:$0xff]  }
  0xfb   : > { %948 = vrot.lane.b32.xlu0 %v485_v20, %s3449_s22 }
  0xfc   : > { %576 = vrot.lane.b32.xlu1 %v494_v45, %s3450_s23  ;;  %v1173_v45 = vld [vmem:[%s4179_s4] sm:$0xff] }
  0xff   : > { %578 = vrot.lane.b32.xlu0 %v495_v47, %s3450_s23 }
 0x100   : > { %574 = vrot.lane.b32.xlu1 %v3443_v1, %s3450_s23 }
 0x103   : > { %669 = vrot.lane.b32.xlu0 %v655_v48, %s3449_s22 }
 0x104   : > { %671 = vrot.lane.b32.xlu1 %v656_v51, %s3449_s22  ;;  %v3403_v51 = vld [vmem:[%s4178_s3 + $0x20] sm:$0xff]  }
 0x107   : > { %667 = vrot.lane.b32.xlu0 %v3443_v1, %s3449_s22  ;;  %s4157_s22 = scalar_lea.vmem %s4182_s7, %s3223_s20 }
 0x108   : > { %1094 = vrot.lane.b32.xlu1 %v3551_v19, %s3450_s23 }
 0x10b   : > { %1096 = vrot.lane.b32.xlu0 %v3561_v21, %s3450_s23  ;;  %s3463_s23 = smov 102  }
 0x10c   : > { %750 = vrot.lane.b32.xlu1 %v736_v55, %s3447_s16  ;;  %v3764_v55 = vpop.f32.mrb[1].mxu1 }
 0x10d   : > { %v3766_v56 = vpop.f32.mrb[2].mxu1 }
 0x10f   : > { %752 = vrot.lane.b32.xlu0 %v737_v57, %s3447_s16  ;;  %v3768_v57 = vpop.f32.mrb[3].mxu1 }
 0x110   : > { %748 = vrot.lane.b32.xlu1 %v3443_v1, %s3447_s16  ;;  %s3460_s16 = smov 12  }
 0x113   : > { %888 = vrot.lane.b32.xlu0 %v875_v58, %s3446_s15  ;;  %v3770_v58 = vpop.f32.mrb[4].mxu1 }
 0x114   : > { %890 = vrot.lane.b32.xlu1 %v3443_v1, %s3446_s15 }
 0x117   : > { %886 = vrot.lane.b32.xlu0 %v874_v59, %s3446_s15  ;;  %s3459_s15 = smov 90  }
 0x11b   : > { %969 = vrot.lane.b32.xlu0 %v3443_v1, %s3445_s14 }
 0x11f   : > { %1035 = vrot.lane.b32.xlu0 %v3583_v40, %s3451_s26 }
 0x123   : > { %1033 = vrot.lane.b32.xlu0 %v3581_v39, %s3451_s26 }
 0x127   : > { %1117 = vrot.lane.b32.xlu0 %v3443_v1, %s3444_s13 }
 0x12b   : > { %1292 = vrot.lane.b32.xlu0 %v3628_v61, %s3452_s27 }
 0x12f   : > { %1450 = vrot.lane.b32.xlu0 %v3637_v63, %s3453_s28 }
 0x133   : > { %2093 = vrot.lane.b32.xlu0 %v3643_v2, %s3454_s29 }
 0x137   : > { %1182 = vperm.xlu0 %3392, %v1174_v3   ;;  %v3405_v3 = vld [vmem:[%s4178_s3 + $0x30] sm:$0xff]  }
 0x13b   : > { %1533 = vrot.lane.b32.xlu0 %v3651_v4, %s3455_s9 }
 0x13f   : > { %2309 = vrot.lane.b32.xlu0 %v3656_v5, %s3456_s10 }
 0x143   : > { %1670 = vrot.lane.b32.xlu0 %v3637_v63, %s3457_s11 }
 0x147   : > { %1315 = vrot.lane.b32.xlu0 %v3581_v39, %s3458_s12 }
 0x14b   : > { %1313 = vrot.lane.b32.xlu0 %v3443_v1, %s3458_s12 }
 0x14f   : > { %1751 = vrot.lane.b32.xlu0 %v3651_v4, %s3459_s15 }
 0x153   : > { %2452 = vrot.lane.b32.xlu0 %v3675_v7, %s3460_s16 }
 0x157   : > { %2108 = vrot.lane.b32.xlu0 %v3443_v1, %s3461_s21 }
 0x165   : > { %v512_v8 = vpop.permute.xlu0 %511 }
 0x166   : > { %v514_v9 = vpop.permute.xlu1 %513 }
 0x167   : > { %v517_v11 = vsel %vm515_vm4, %v512_v8, %v514_v9 }
 0x168   : > { %524 = vmatprep.subr.bf16.mxu1 %v517_v11  ;;  %v3779_v11 = vpop.f32.mrb[5].mxu1 }
 0x169   : > { %v510_v12 = vpop.permute.xlu0 %509 }
 0x16a   : > { %v516_v13 = vsel %vm515_vm4, %v510_v12, %v512_v8  ;;  %v947_v14 = vpop.permute.xlu1 %946  ;;  %v3781_v12 = vpop.f32.mrb[6].mxu1 }
 0x16b   : > { %525 = vmatpush1.bf16.msra.mxu1 %v516_v13  ;;  %vm951_vm9 = vcmp.ne.s16.totalorder %v947_v14, 0  ;;  %v3783_v13 = vpop.f32.mrb[7].mxu1 }
 0x16c   : > { %v953_v24 = vsel %vm951_vm9, %v3581_v39, 0  ;;  %vm2313_vm9 = vcmask 949248  }
 0x16d   : > { %v949_v10 = vpop.permute.xlu0 %948 }
 0x16e   : > { %v950_v17 = vsel %vm673_vm5, %v947_v14, %v949_v10  ;;  %3079 = vmatmul.mubr.msk.bf16.vlgmr.msra.gmra.mrb[8].mxu1 %vm515_vm4, %v3399_v16  ;;  %v577_v18 = vpop.permute.xlu1 %576 }
 0x16f   : > { %vm952_vm6 = vcmp.ne.s16.totalorder %v950_v17, 0  ;;  %620 = vmatprep.mubr.bf16.mxu1 %v3443_v1  ;;  %v3406_v17 = vld [vmem:[%s4178_s3 + $0x38] sm:$0xff]  }
 0x170   : > { %v954_v19 = vsel %vm952_vm6, %v3583_v40, 0 }
 0x171   : > { %967 = vrot.lane.b32.xlu1 %v954_v19, %s3445_s14  ;;  %v579_v20 = vpop.permute.xlu0 %578 }
 0x172   : > { %v575_v21 = vpop.permute.xlu1 %574  ;;  %v582_v22 = vsel %vm580_vm7, %v577_v18, %v579_v20 }
 0x173   : > { %v581_v23 = vsel %vm580_vm7, %v575_v21, %v577_v18  ;;  %588 = vmatprep.subr.bf16.mxu1 %v582_v22 }
 0x174   : > { %589 = vmatpush1.bf16.msra.mxu1 %v581_v23 }
 0x175   : > { %965 = vrot.lane.b32.xlu1 %v953_v24, %s3445_s14  ;;  %v670_v25 = vpop.permute.xlu0 %669 }
 0x176   : > { %v672_v26 = vpop.permute.xlu1 %671 }
 0x177   : > { %v675_v28 = vsel %vm673_vm5, %v670_v25, %v672_v26 }
 0x178   : > { %681 = vmatprep.subr.bf16.mxu1 %v675_v28  ;;  %v3407_v28 = vld [vmem:[%s4178_s3 + $0x40] sm:$0xff]  }
 0x179   : > { %1037 = vrot.lane.b32.xlu1 %v3443_v1, %s3451_s26  ;;  %v668_v29 = vpop.permute.xlu0 %667 }
 0x17a   : > { %v674_v30 = vsel %vm673_vm5, %v668_v29, %v670_v25  ;;  %v1095_v31 = vpop.permute.xlu1 %1094  ;;  %3081 = vmatmul.mubr.msk.bf16.vlgmr.msra.gmra.mrb[8].mxu1 %vm515_vm4, %v3400_v27 }
 0x17b   : > { %682 = vmatpush1.bf16.msra.mxu1 %v674_v30  ;;  %713 = vmatprep.mubr.bf16.mxu1 %v3443_v1  ;;  %vm1099_vm12 = vcmp.ne.s16.totalorder %v1095_v31, 0 }
 0x17c   : > { %v1101_v42 = vsel %vm1099_vm12, %v3581_v39, 0 }
 0x17d   : > { %v1097_v32 = vpop.permute.xlu0 %1096 }
 0x17e   : > { %v1098_v33 = vsel %vm580_vm7, %v1095_v31, %v1097_v32  ;;  %v751_v34 = vpop.permute.xlu1 %750 }
 0x17f   : > { %vm1100_vm11 = vcmp.ne.s16.totalorder %v1098_v33, 0 }
 0x180   : > { %v1102_v35 = vsel %vm1100_vm11, %v3583_v40, 0 }
 0x181   : > { %1115 = vrot.lane.b32.xlu1 %v1102_v35, %s3444_s13  ;;  %v753_v36 = vpop.permute.xlu0 %752 }
 0x182   : > { %v756_v37 = vsel %vm754_vm0, %v751_v34, %v753_v36  ;;  %v749_v41 = vpop.permute.xlu1 %748 }
 0x183   : > { %762 = vmatprep.subr.bf16.mxu1 %v756_v37  ;;  %v755_v43 = vsel %vm754_vm0, %v749_v41, %v751_v34 }
 0x185   : > { %1113 = vrot.lane.b32.xlu1 %v1101_v42, %s3444_s13  ;;  %v889_v47 = vpop.permute.xlu0 %888 }
 0x186   : > { %3085 = vmatmul.mubr.msk.bf16.vlgmr.msra.gmra.mrb[8].mxu1 %vm515_vm4, %v3401_v38  ;;  %v891_v48 = vpop.permute.xlu1 %890 }
 0x187   : > { %763 = vmatpush1.bf16.msra.mxu1 %v755_v43  ;;  %794 = vmatprep.mubr.bf16.mxu1 %v3443_v1  ;;  %v893_v49 = vsel %vm732_vm14, %v889_v47, %v891_v48 }
 0x188   : > { %820 = vmatprep.subr.bf16.mxu1 %v3583_v40 }
 0x189   : > { %1294 = vrot.lane.b32.xlu1 %v3651_v4, %s3452_s27  ;;  %v887_v52 = vpop.permute.xlu0 %886 }
 0x18a   : > { %v892_v53 = vsel %vm732_vm14, %v887_v52, %v889_v47  ;;  %vm1039_vm14 = vcmask 916480  }
 0x18d   : > { %1452 = vrot.lane.b32.xlu1 %v3721_v44, %s3453_s28  ;;  %v970_v59 = vpop.permute.xlu0 %969 }
 0x191   : > { %1177 = vperm.xlu1 %3393, %v1173_v45   ;;  %v1036_v62 = vpop.permute.xlu0 %1035 }
 0x192   : > { %3089 = vmatmul.mubr.msk.bf16.vlgmr.msra.gmra.mrb[8].mxu1 %vm515_vm4, %v3402_v46 }
 0x193   : > { %821 = vmatpush1.bf16.msra.mxu1 %v3581_v39  ;;  %852 = vmatprep.mubr.bf16.mxu1 %v3443_v1 }
 0x194   : > { %899 = vmatprep.subr.bf16.mxu1 %v893_v49 }
 0x195   : > { %1531 = vrot.lane.b32.xlu1 %v3628_v61, %s3455_s9  ;;  %v1034_v4 = vpop.permute.xlu0 %1033 }
 0x196   : > { %v1040_v9 = vsel %vm1039_vm14, %v1034_v4, %v1036_v62 }
 0x199   : > { %2234 = vrot.lane.b32.xlu1 %v3739_v50, %s3462_s8  ;;  %v1118_v14 = vpop.permute.xlu0 %1117 }
 0x19d   : > { %2311 = vrot.lane.b32.xlu1 %v3643_v2, %s3456_s10  ;;  %v1293_v19 = vpop.permute.xlu0 %1292 }
 0x19e   : > { %3093 = vmatmul.mubr.msk.bf16.vlgmr.msra.gmra.mrb[8].mxu1 %vm515_vm4, %v3403_v51 }
 0x19f   : > { %900 = vmatpush1.bf16.msra.mxu1 %v892_v53  ;;  %931 = vmatprep.mubr.bf16.mxu1 %v3443_v1 }
 0x1a1   : > { %1672 = vrot.lane.b32.xlu1 %v3721_v44, %s3457_s11  ;;  %v1451_v24 = vpop.permute.xlu0 %1450 }
 0x1a5   : > { %1317 = vrot.lane.b32.xlu1 %v3583_v40, %s3458_s12  ;;  %v2094_v30 = vpop.permute.xlu0 %2093 }
 0x1a6   : > { %vm2095_vm1 = vcmp.ne.s16.totalorder %v2094_v30, 0 }
 0x1a7   : > { %v2096_v32 = vsel %vm2095_vm1, %v3581_v39, 0 }
 0x1a9   : > { %1749 = vrot.lane.b32.xlu1 %v3628_v61, %s3459_s15 }
 0x1aa   : > { %3097 = vmatmul.mubr.msk.bf16.vlgmr.msra.gmra.mrb[8].mxu1 %vm515_vm4, %v3404_v15 }
 0x1ab   : > { %1010 = vmatprep.mubr.bf16.mxu1 %v3443_v1 }
 0x1b6   : > { %v3811_v31 = vpop.permute.xlu0 %1182 }
 0x1ba   : > { %v1534_v33 = vpop.permute.xlu0 %1533 }
 0x1bb   : > { %vm1538_vm6 = vcmp.ne.s16.totalorder %v1534_v33, 0 }
 0x1bc   : > { %v1540_v45 = vsel %vm1538_vm6, %v3583_v40, 0  ;;  %vm2335_vm6 = vcmask 97280  }
 0x1be   : > { %v2310_v36 = vpop.permute.xlu0 %2309 }
 0x1e3   : > { %v968_v60 = vpop.permute.xlu1 %967 }
 0x1e4   : > { %v972_v0 = vsel %vm651_vm10, %v968_v60, %v970_v59 }
 0x1e5   : > { %978 = vmatprep.subr.bf16.mxu1 %v972_v0 }
 0x1e7   : > { %v966_v61 = vpop.permute.xlu1 %965 }
 0x1e8   : > { %v971_v2 = vsel %vm651_vm10, %v966_v61, %v968_v60  ;;  %vm1296_vm10 = vcmask 211968  }
 0x1e9   : > { %979 = vmatpush1.bf16.msra.mxu1 %v971_v2 }
 0x1eb   : > { %v1038_v6 = vpop.permute.xlu1 %1037 }
 0x1ec   : > { %3101 = vmatmul.mubr.msk.bf16.vlgmr.msra.gmra.mrb[8].mxu1 %vm515_vm4, %v3405_v3  ;;  %v1041_v8 = vsel %vm1039_vm14, %v1036_v62, %v1038_v6  ;;  %vm1557_vm14 = vcmask 48128  }
 0x1ed   : > { %1047 = vmatprep.subr.bf16.mxu1 %v1041_v8  ;;  %1079 = vmatprep.mubr.bf16.mxu1 %v3443_v1 }
 0x1ee   : > { %1048 = vmatpush1.bf16.msra.mxu1 %v1040_v9 }
 0x1f3   : > { %v1116_v16 = vpop.permute.xlu1 %1115 }
 0x1f4   : > { %v1120_v10 = vsel %vm490_vm8, %v1116_v16, %v1118_v14 }
 0x1f5   : > { %1126 = vmatprep.subr.bf16.mxu1 %v1120_v10 }
 0x1f7   : > { %v1114_v18 = vpop.permute.xlu1 %1113 }
 0x1f8   : > { %v1119_v20 = vsel %vm490_vm8, %v1114_v18, %v1116_v16  ;;  %3105 = vmatmul.mubr.msk.bf16.vlgmr.msra.gmra.mrb[8].mxu1 %vm515_vm4, %v3406_v17 }
 0x1f9   : > { %1127 = vmatpush1.bf16.msra.mxu1 %v1119_v20  ;;  %1158 = vmatprep.mubr.bf16.mxu1 %v3443_v1 }
 0x1fb   : > { %v1295_v21 = vpop.permute.xlu1 %1294 }
 0x1fc   : > { %v1297_v22 = vsel %vm1296_vm10, %v1293_v19, %v1295_v21  ;;  %vm1299_vm0 = vcmp.ne.s16.totalorder %v1295_v21, 0 }
 0x1fd   : > { %vm1298_vm13 = vcmp.ne.s16.totalorder %v1297_v22, 0  ;;  %v1301_v23 = vsel %vm1299_vm0, %v3583_v40, 0  ;;  %vm1476_vm0 = vcmask 736256   ;;  %v3408_v22 = vld [vmem:[%s4178_s3 + $0x98] sm:$0xff]  }
 0x1fe   : > { %1381 = vrot.lane.b32.xlu0 %v1301_v23, %s3463_s23  ;;  %v1300_v25 = vsel %vm1298_vm13, %v3581_v39, 0 }
 0x1ff   : > { %v1453_v26 = vpop.permute.xlu1 %1452  ;;  %1379 = vrot.lane.b32.xlu1 %v1300_v25, %s3463_s23 }
 0x200   : > { %v1455_v27 = vsel %vm1454_vm15, %v1451_v24, %v1453_v26  ;;  %vm1457_vm2 = vcmp.ne.s16.totalorder %v1453_v26, 0 }
 0x201   : > { %vm1456_vm8 = vcmp.ne.s16.totalorder %v1455_v27, 0  ;;  %v1459_v35 = vsel %vm1457_vm2, %v3583_v40, 0 }
 0x202   : > { %v1458_v29 = vsel %vm1456_vm8, %v3581_v39, 0 }
 0x203   : > { %1377 = vrot.lane.b32.xlu1 %v3443_v1, %s3463_s23  ;;  %1472 = vrot.lane.b32.xlu0 %v1458_v29, %s3459_s15 }
 0x204   : > { %3109 = vmatmul.mubr.msk.bf16.vlgmr.msra.gmra.mrb[8].mxu1 %vm515_vm4, %v3407_v28 }
 0x205   : > { %2151 = vmatprep.mubr.bf16.mxu1 %v3443_v1 }
 0x207   : > { %2454 = vrot.lane.b32.xlu1 %v3739_v50, %s3460_s16  ;;  %1470 = vrot.lane.b32.xlu0 %v3443_v1, %s3459_s15 }
 0x20b   : > { %2110 = vrot.lane.b32.xlu1 %v3581_v39, %s3461_s21  ;;  %2170 = vrot.lane.b32.xlu0 %v2096_v32, %s3462_s8 }
 0x20f   : > { %2168 = vrot.lane.b32.xlu1 %v3443_v1, %s3462_s8  ;;  %1897 = vrot.lane.b32.xlu0 %v3637_v63, %s3463_s23  ;;  %v1671_v63 = vpop.permute.xlu0 %1670 }
 0x210   : > { %v3821_v34 = vpop.permute.xlu1 %1177  ;;  %vm1675_vm1 = vcmp.ne.s16.totalorder %v1671_v63, 0 }
 0x211   : > { %v1677_v62 = vsel %vm1675_vm1, %v3581_v39, 0 }
 0x213   : > { %1474 = vrot.lane.b32.xlu1 %v1459_v35, %s3459_s15  ;;  %v3837_v46 = vpop.permute.xlu0 %1315  ;;  %v3409_v35 = vld [vmem:[%s4178_s3 + $0x90] sm:$0xff]  }
 0x214   : > { %v1532_v37 = vpop.permute.xlu1 %1531 }
 0x215   : > { %v1536_v38 = vsel %vm1535_vm3, %v1532_v37, %v1534_v33 }
 0x216   : > { %vm1537_vm5 = vcmp.ne.s16.totalorder %v1536_v38, 0 }
 0x217   : > { %2531 = vrot.lane.b32.xlu1 %v3656_v5, %s3454_s29  ;;  %v1539_v41 = vsel %vm1537_vm5, %v3581_v39, 0  ;;  %v3847_v50 = vpop.permute.xlu0 %1313  ;;  %vm1383_vm5 = vcmask 834560  }
 0x218   : > { %v2235_v42 = vpop.permute.xlu1 %2234  ;;  %1553 = vrot.lane.b32.xlu0 %v1539_v41, %s3457_s11 }
 0x219   : > { %vm2236_vm7 = vcmp.ne.s16.totalorder %v2235_v42, 0 }
 0x21a   : > { %v2237_v5 = vsel %vm2236_vm7, %v3581_v39, 0 }
 0x21b   : > { %1899 = vrot.lane.b32.xlu1 %v3721_v44, %s3463_s23  ;;  %v1752_v15 = vpop.permute.xlu0 %1751 }
 0x21c   : > { %v2312_v43 = vpop.permute.xlu1 %2311  ;;  %1551 = vrot.lane.b32.xlu0 %v3443_v1, %s3457_s11 }
 0x21d   : > { %v2314_v47 = vsel %vm2313_vm9, %v2310_v36, %v2312_v43  ;;  %vm2316_vm11 = vcmp.ne.s16.totalorder %v2312_v43, 0 }
 0x21e   : > { %vm2315_vm12 = vcmp.ne.s16.totalorder %v2314_v47, 0  ;;  %v2318_v44 = vsel %vm2316_vm11, %v3583_v40, 0  ;;  %vm2112_vm11 = vcmask 523264  }
 0x21f   : > { %1555 = vrot.lane.b32.xlu1 %v1540_v45, %s3457_s11  ;;  %v2317_v51 = vsel %vm2315_vm12, %v3581_v39, 0  ;;  %s3464_s11 = smov 32   ;;  %v2453_v61 = vpop.permute.xlu0 %2452 }
 0x220   : > { %v1673_v48 = vpop.permute.xlu1 %1672  ;;  %2249 = vrot.lane.b32.xlu0 %v2237_v5, %s3454_s29  ;;  %vm2457_vm12 = vcmp.ne.s16.totalorder %v2453_v61, 0 }
 0x221   : > { %v1674_v52 = vsel %vm1557_vm14, %v1671_v63, %v1673_v48  ;;  %v2459_v24 = vsel %vm2457_vm12, %v3581_v39, 0  ;;  %v3150_v48 = vld [vmem:[%s4179_s4 + $0x10] sm:$0xff] }
 0x222   : > { %vm1676_vm13 = vcmp.ne.s16.totalorder %v1674_v52, 0  ;;  %v3410_v52 = vld [vmem:[%s4178_s3 + $0xa0] sm:$0xff]  }
 0x223   : > { %2247 = vrot.lane.b32.xlu1 %v3443_v1, %s3454_s29  ;;  %v1678_v60 = vsel %vm1676_vm13, %v3583_v40, 0  ;;  %v3875_v2 = vpop.permute.xlu0 %2108  ;;  %vm2172_vm13 = vcmask 621568  }
 0x224   : > { %v3844_v49 = vpop.permute.xlu1 %1317  ;;  %2333 = vrot.lane.b32.xlu0 %v2318_v44, %s3460_s16 }
 0x227   : > { %2331 = vrot.lane.b32.xlu1 %v2317_v51, %s3460_s16 }
 0x228   : > { %2660 = vrot.lane.b32.xlu0 %v3675_v7, %s3462_s8  ;;  %v1750_v53 = vpop.permute.xlu1 %1749 }
 0x229   : > { %vm1754_vm8 = vcmp.ne.s16.totalorder %v1750_v53, 0  ;;  %v1753_v59 = vsel %vm1476_vm0, %v1750_v53, %v1752_v15  ;;  %v3196_v15 = vld [vmem:[%s4179_s4 + $0x20] sm:$0xff] }
 0x22a   : > { %v1756_v7 = vsel %vm1754_vm8, %v3581_v39, 0  ;;  %vm1755_vm2 = vcmp.ne.s16.totalorder %v1753_v59, 0 }
 0x22b   : > { %2329 = vrot.lane.b32.xlu1 %v3443_v1, %s3460_s16  ;;  %v1757_v0 = vsel %vm1755_vm2, %v3583_v40, 0  ;;  %vm2251_vm2 = vcmask 424960  }
 0x22c   : > { %1693 = vrot.lane.b32.xlu0 %v3443_v1, %s3455_s9 }
 0x22f   : > { %1691 = vrot.lane.b32.xlu1 %v1678_v60, %s3455_s9 }
 0x230   : > { %1768 = vrot.lane.b32.xlu0 %v1756_v7, %s3453_s28 }
 0x233   : > { %1689 = vrot.lane.b32.xlu1 %v1677_v62, %s3455_s9 }
 0x234   : > { %1770 = vrot.lane.b32.xlu0 %v1757_v0, %s3453_s28  ;;  %v3208_v0 = vld [vmem:[%s4179_s4 + $0x30] sm:$0xff] }
 0x237   : > { %1772 = vrot.lane.b32.xlu1 %v3443_v1, %s3453_s28 }
 0x238   : > { %2475 = vrot.lane.b32.xlu0 %v3443_v1, %s3456_s10 }
 0x23c   : > { %1838 = vrot.lane.b32.xlu0 %v3583_v40, %s3464_s11 }
 0x240   : > { %1836 = vrot.lane.b32.xlu0 %v3581_v39, %s3464_s11 }
 0x270   : > { %v1382_v3 = vpop.permute.xlu0 %1381 }
 0x271   : > { %v1380_v4 = vpop.permute.xlu1 %1379 }
 0x272   : > { %v3878_v6 = vsel %vm1383_vm5, %v1380_v4, %v1382_v3 }
 0x275   : > { %v1378_v8 = vpop.permute.xlu1 %1377  ;;  %v1473_v9 = vpop.permute.xlu0 %1472 }
 0x276   : > { %v3881_v14 = vsel %vm1383_vm5, %v1378_v8, %v1380_v4  ;;  %v3151_v4 = vld [vmem:[%s4179_s4 + $0x18] sm:$0xff]  ;;  %v409_v8 = vld [vmem:[%s4181_s6] sm:$0xff] }
 0x279   : > { %v2455_v16 = vpop.permute.xlu1 %2454  ;;  %v1471_v10 = vpop.permute.xlu0 %1470 }
 0x27a   : > { %v2456_v17 = vsel %vm2335_vm6, %v2453_v61, %v2455_v16  ;;  %v3885_v18 = vsel %vm1476_vm0, %v1471_v10, %v1473_v9  ;;  %v3197_v16 = vld [vmem:[%s4179_s4 + $0x28] sm:$0xff] }
 0x27b   : > { %vm2458_vm7 = vcmp.ne.s16.totalorder %v2456_v17, 0  ;;  %v3411_v10 = vld [vmem:[%s4178_s3 + $0xa8] sm:$0xff]   ;;  %v411_v17 = vld [vmem:[%s4181_s6 + $0x10] sm:$0xff] }
 0x27c   : > { %v2460_v19 = vsel %vm2458_vm7, %v3583_v40, 0 }
 0x27d   : > { %v2111_v20 = vpop.permute.xlu1 %2110  ;;  %2473 = vrot.lane.b32.xlu1 %v2460_v19, %s3456_s10  ;;  %v2171_v23 = vpop.permute.xlu0 %2170 }
 0x27e   : > { %v2113_v21 = vsel %vm2112_vm11, %v3875_v2, %v2111_v20  ;;  %v3209_v20 = vld [vmem:[%s4179_s4 + $0x38] sm:$0xff] }
 0x27f   : > { %2119 = vmatprep.subr.bf16.mxu1 %v2113_v21 }
 0x280   : > { %2120 = vmatpush1.bf16.msra.mxu1 %v3875_v2 }
 0x281   : > { %v3896_v25 = vpop.permute.xlu1 %2168  ;;  %2471 = vrot.lane.b32.xlu1 %v2459_v24, %s3456_s10  ;;  %v1898_v28 = vpop.permute.xlu0 %1897  ;;  %v3413_v24 = vld [vmem:[%s4178_s3 + $0xb0] sm:$0xff]  }
 0x282   : > { %v2173_v26 = vsel %vm2172_vm13, %v3896_v25, %v2171_v23  ;;  %v412_v23 = vld [vmem:[%s4181_s6 + $0x18] sm:$0xff] }
 0x283   : > { %3165 = vmatmul.mubr.msk.bf16.vlgmr.msra.gmra.mrb[12].mxu1 %vm515_vm4, %v3408_v22  ;;  %2179 = vmatprep.subr.bf16.mxu1 %v2173_v26  ;;  %v410_v22 = vld [vmem:[%s4181_s6 + $0x8] sm:$0xff] }
 0x284   : > { %2180 = vmatpush1.bf16.msra.mxu1 %v3896_v25  ;;  %2211 = vmatprep.mubr.bf16.mxu1 %v3443_v1 }
 0x285   : > { %v1475_v27 = vpop.permute.xlu1 %1474  ;;  %1840 = vrot.lane.b32.xlu1 %v3443_v1, %s3464_s11 }
 0x286   : > { %v3907_v29 = vsel %vm1476_vm0, %v1473_v9, %v1475_v27  ;;  %vm1902_vm0 = vcmp.ne.s16.totalorder %v1898_v28, 0 }
 0x287   : > { %v1904_v5 = vsel %vm1902_vm0, %v3581_v39, 0 }
 0x289   : > { %v2532_v30 = vpop.permute.xlu1 %2531 }
 0x28a   : > { %vm2533_vm8 = vcmp.ne.s16.totalorder %v2532_v30, 0  ;;  %v1554_v32 = vpop.permute.xlu0 %1553 }
 0x28b   : > { %v2534_v33 = vsel %vm2533_vm8, %v3583_v40, 0 }
 0x28c   : > { %2544 = vrot.lane.b32.xlu1 %v2534_v33, %s3462_s8 }
 0x28d   : > { %v1900_v36 = vpop.permute.xlu1 %1899 }
 0x28e   : > { %v1901_v37 = vsel %vm1383_vm5, %v1898_v28, %v1900_v36  ;;  %v1552_v38 = vpop.permute.xlu0 %1551  ;;  %vm1319_vm5 = vcmask 785408  }
 0x28f   : > { %vm1903_vm1 = vcmp.ne.s16.totalorder %v1901_v37, 0  ;;  %v3916_v41 = vsel %vm1557_vm14, %v1552_v38, %v1554_v32  ;;  %3167 = vmatmul.mubr.msk.bf16.vlgmr.msra.gmra.mrb[12].mxu1 %vm515_vm4, %v3409_v35 }
 0x290   : > { %1920 = vrot.lane.b32.xlu1 %v3443_v1, %s3452_s27  ;;  %v1905_v42 = vsel %vm1903_vm1, %v3583_v40, 0  ;;  %2290 = vmatprep.mubr.bf16.mxu1 %v3443_v1 }
 0x291   : > { %v1556_v63 = vpop.permute.xlu1 %1555  ;;  %1918 = vrot.lane.b32.xlu0 %v1905_v42, %s3452_s27 }
 0x292   : > { %v2250_v43 = vpop.permute.xlu0 %2249  ;;  %v3925_v45 = vsel %vm1557_vm14, %v1554_v32, %v1556_v63 }
 0x294   : > { %2606 = vrot.lane.b32.xlu1 %v3583_v40, %s3461_s21 }
 0x295   : > { %v3930_v47 = vpop.permute.xlu1 %2247  ;;  %1916 = vrot.lane.b32.xlu0 %v1904_v5, %s3452_s27 }
 0x296   : > { %v2334_v44 = vpop.permute.xlu0 %2333  ;;  %v2252_v51 = vsel %vm2251_vm2, %v3930_v47, %v2250_v43 }
 0x297   : > { %2258 = vmatprep.subr.bf16.mxu1 %v2252_v51 }
 0x298   : > { %1981 = vperm.xlu1 %3393, %v3150_v48   ;;  %2259 = vmatpush1.bf16.msra.mxu1 %v3930_v47 }
 0x299   : > { %v2332_v53 = vpop.permute.xlu1 %2331 }
 0x29a   : > { %v2661_v59 = vpop.permute.xlu0 %2660  ;;  %v2337_v60 = vsel %vm2335_vm6, %v2332_v53, %v2334_v44  ;;  %v1321_v44 = vsel %vm1319_vm5, %v3837_v46, %v3844_v49 }
 0x29b   : > { %vm2662_vm14 = vcmp.ne.s16.totalorder %v2661_v59, 0  ;;  %3171 = vmatmul.mubr.msk.bf16.vlgmr.msra.gmra.mrb[12].mxu1 %vm515_vm4, %v3410_v52  ;;  %2343 = vmatprep.subr.bf16.mxu1 %v2337_v60  ;;  %v3414_v52 = vld [vmem:[%s4180_s5 + $0x8] sm:$0xff]   ;;  %v3416_v60 = vld [vmem:[%s4178_s3 + $0xb8] sm:$0xff]  }
 0x29c   : > { %v2663_v7 = vsel %vm2662_vm14, %v3583_v40, 0  ;;  %2732 = vperm.xlu1 %3393, %v3196_v15   ;;  %2375 = vmatprep.mubr.bf16.mxu1 %v3443_v1  ;;  %v3415_v15 = vld [vmem:[%s4178_s3 + $0x50] sm:$0xff]  }
 0x29d   : > { %v2330_v62 = vpop.permute.xlu1 %2329  ;;  %2673 = vrot.lane.b32.xlu0 %v2663_v7, %s3454_s29 }
 0x29e   : > { %v2336_v61 = vsel %vm2335_vm6, %v2330_v62, %v2332_v53  ;;  %v3954_v3 = vpop.permute.xlu0 %1693 }
 0x29f   : > { %2344 = vmatpush1.bf16.msra.mxu1 %v2336_v61 }
 0x2a0   : > { %2840 = vperm.xlu1 %3393, %v3208_v0   ;;  %2401 = vmatprep.subr.bf16.mxu1 %v3583_v40  ;;  %v3417_v0 = vld [vmem:[%s4178_s3 + $0x48] sm:$0xff]  }
 0x2a1   : > { %1986 = vperm.xlu0 %3392, %v3151_v4   ;;  %v3999_v5 = vpop.permute.xlu1 %1691 }
 0x2a2   : > { %v1769_v9 = vpop.permute.xlu0 %1768 }
 0x2a4   : > { %415 = vperm.xlu1 %3393, %v409_v8  }
 0x2a5   : > { %2737 = vperm.xlu0 %3392, %v3197_v16   ;;  %v4008_v51 = vpop.permute.xlu1 %1689 }
 0x2a6   : > { %v3972_v19 = vpop.permute.xlu0 %1770 }
 0x2a7   : > { %v3979_v21 = vsel %vm1454_vm15, %v1769_v9, %v3972_v19  ;;  %3175 = vmatmul.mubr.msk.bf16.vlgmr.msra.gmra.mrb[12].mxu1 %vm515_vm4, %v3411_v10  ;;  %v3419_v10 = vld [vmem:[%s4178_s3 + $0x58] sm:$0xff]  }
 0x2a8   : > { %2402 = vmatpush1.bf16.msra.mxu1 %v3581_v39  ;;  %425 = vperm.xlu1 %3393, %v411_v17  }
 0x2a9   : > { %2845 = vperm.xlu0 %3392, %v3209_v20   ;;  %2433 = vmatprep.mubr.bf16.mxu1 %v3443_v1  ;;  %v4016_v53 = vpop.permute.xlu1 %1772  ;;  %v3421_v20 = vld [vmem:[%s4178_s3 + $0x60] sm:$0xff]  }
 0x2ad   : > { %420 = vperm.xlu0 %3392, %v410_v22   ;;  %v3423_v22 = vld [vmem:[%s4178_s3 + $0x68] sm:$0xff]  }
 0x2b1   : > { %430 = vperm.xlu0 %3392, %v412_v23   ;;  %v1695_v23 = vsel %vm1535_vm3, %v4008_v51, %v3999_v5 }
 0x2b3   : > { %3179 = vmatmul.mubr.msk.bf16.vlgmr.msra.gmra.mrb[12].mxu1 %vm515_vm4, %v3413_v24  ;;  %v3424_v24 = vld [vmem:[%s4178_s3 + $0x70] sm:$0xff]  }
 0x2b4   : > { %2516 = vmatprep.mubr.bf16.mxu1 %v3443_v1 }
 0x2d7   : > { %v1160_v26 = vpop.f32.mrb[8].mxu1 }
 0x2d8   : > { %v1185_v27 = vadd.f32 %v3821_v34, %v1160_v26  ;;  %v1162_v28 = vpop.f32.mrb[9].mxu1 }
 0x2d9   : > { %v1186_v30 = vadd.f32 %v3821_v34, %v1162_v28  ;;  %v1164_v32 = vpop.f32.mrb[10].mxu1  ;;  %v3412_v34 = vld [vmem:[%s4180_s5] sm:$0xff]  }
 0x2da   : > { %v1187_v33 = vadd.f32 %v3811_v31, %v1164_v32  ;;  %v1166_v35 = vpop.f32.mrb[11].mxu1  ;;  %v1189_v37 = vmax.f32 %v1185_v27, 0.0  ;;  %v3427_v32 = vld [vmem:[%s4178_s3 + $0x88] sm:$0xff]  }
 0x2db   : > { %v1188_v36 = vadd.f32 %v3811_v31, %v1166_v35  ;;  %v1190_v42 = vmax.f32 %v1186_v30, 0.0  ;;  %v1320_v31 = vsel %vm1319_vm5, %v3847_v50, %v3837_v46  ;;  %v2476_v46 = vpop.permute.xlu0 %2475 }
 0x2dc   : > { %v1191_v38 = vmax.f32 %v1187_v33, 0.0 }
 0x2dd   : > { %v1192_v63 = vmax.f32 %v1188_v36, 0.0 }
 0x2de   : > { %v1193_v43 = vpack.c.bf16 %v1191_v38, %v1189_v37 }
 0x2df   : > { %v1194_v48 = vpack.c.bf16 %v1192_v63, %v1190_v42  ;;  %v1839_v62 = vpop.permute.xlu0 %1838 }
 0x2e1   : > { %1215 = vmatprep.subr.bf16.mxu0 %v1194_v48 }
 0x2e2   : > { %1216 = vmatpush1.bf16.msra.mxu0 %v1193_v43 }
 0x2e3   : > { %1327 = vmatprep.subr.bf16.mxu0 %v1321_v44  ;;  %v1837_v4 = vpop.permute.xlu0 %1836 }
 0x2e5   : > { %3112 = vmatmul.mubr.msk.bf16.vlgmr.msra.gmra.mrb[4].mxu0 %vm515_vm4, %v3412_v34 }
 0x2e6   : > { %1328 = vmatpush1.bf16.msra.mxu0 %v1320_v31  ;;  %1257 = vmatprep.mubr.bf16.mxu0 %v3443_v1 }
 0x2e7   : > { %1391 = vmatprep.subr.bf16.mxu0 %v3878_v6 }
 0x2ed   : > { %3113 = vmatmul.mubr.msk.bf16.gmra.mrb[8].mxu0 %vm515_vm4, %v3414_v52 }
 0x2ee   : > { %1359 = vmatprep.mubr.bf16.mxu0 %v3443_v1 }
 0x2ef   : > { %v2474_v49 = vpop.permute.xlu1 %2473 }
 0x2f0   : > { %v2478_v50 = vsel %vm2313_vm9, %v2474_v49, %v2476_v46 }
 0x2f1   : > { %2484 = vmatprep.subr.bf16.mxu1 %v2478_v50 }
 0x2f3   : > { %v2472_v6 = vpop.permute.xlu1 %2471 }
 0x2f4   : > { %v2477_v59 = vsel %vm2313_vm9, %v2472_v6, %v2474_v49  ;;  %vm1842_vm9 = vcmask 261120  }
 0x2f5   : > { %3119 = vmatmul.mubr.msk.bf16.vlgmr.msra.gmra.mrb[12].mxu0 %vm515_vm4, %v3415_v15  ;;  %2485 = vmatpush1.bf16.msra.mxu1 %v2477_v59  ;;  %v1843_v27 = vsel %vm1842_vm9, %v1837_v4, %v1839_v62 }
 0x2f6   : > { %1392 = vmatpush1.bf16.msra.mxu0 %v3881_v14  ;;  %2551 = vmatprep.subr.bf16.mxu1 %v3896_v25 }
 0x2f7   : > { %1484 = vmatprep.subr.bf16.mxu0 %v3907_v29  ;;  %1423 = vmatprep.mubr.bf16.mxu0 %v3443_v1  ;;  %v1841_v7 = vpop.permute.xlu1 %1840  ;;  %v3418_v29 = vld [vmem:[%s4178_s3 + $0xc0] sm:$0xff]  }
 0x2f8   : > { %3183 = vmatmul.mubr.msk.bf16.vlgmr.msra.gmra.mrb[12].mxu1 %vm515_vm4, %v3416_v60  ;;  %v1844_v26 = vsel %vm1842_vm9, %v1839_v62, %v1841_v7 }
 0x2f9   : > { %2583 = vmatprep.mubr.bf16.mxu1 %v3443_v1 }
 0x2fe   : > { %v2545_v61 = vpop.permute.xlu1 %2544 }
 0x2ff   : > { %v2546_v14 = vsel %vm2172_vm13, %v2545_v61, %v3896_v25 }
 0x300   : > { %2552 = vmatpush1.bf16.msra.mxu1 %v2546_v14 }
 0x301   : > { %3121 = vmatmul.mubr.msk.bf16.vlgmr.msra.gmra.mrb[12].mxu0 %vm515_vm4, %v3417_v0  ;;  %2613 = vmatprep.subr.bf16.mxu1 %v3875_v2 }
 0x302   : > { %1485 = vmatpush1.bf16.msra.mxu0 %v3885_v18  ;;  %v1921_v8 = vpop.permute.xlu1 %1920  ;;  %1516 = vmatprep.mubr.bf16.mxu0 %v3443_v1 }
 0x303   : > { %1565 = vmatprep.subr.bf16.mxu0 %v3925_v45  ;;  %v1919_v25 = vpop.permute.xlu0 %1918  ;;  %v3420_v45 = vld [vmem:[%s4178_s3 + $0xc8] sm:$0xff]  }
 0x304   : > { %3187 = vmatmul.mubr.msk.bf16.vlgmr.msra.gmra.mrb[12].mxu1 %vm515_vm4, %v3418_v29  ;;  %v1923_v28 = vsel %vm1296_vm10, %v1919_v25, %v1921_v8 }
 0x305   : > { %2645 = vmatprep.mubr.bf16.mxu1 %v3443_v1 }
 0x306   : > { %v2607_v9 = vpop.permute.xlu1 %2606 }
 0x307   : > { %v2608_v16 = vsel %vm2112_vm11, %v2607_v9, %v3875_v2  ;;  %v1917_v18 = vpop.permute.xlu0 %1916  ;;  %v3428_v9 = vld [vmem:[%s4180_s5 + $0x10] sm:$0xff]  }
 0x308   : > { %2614 = vmatpush1.bf16.msra.mxu1 %v2608_v16  ;;  %v1922_v30 = vsel %vm1296_vm10, %v1917_v18, %v1919_v25  ;;  %v3429_v16 = vld [vmem:[%s4180_s5 + $0x18] sm:$0xff]  }
 0x309   : > { %2680 = vmatprep.subr.bf16.mxu1 %v3930_v47  ;;  %v3432_v18 = vld [vmem:[%s4178_s3 + $0xf8] sm:$0xff]  }
 0x30d   : > { %3125 = vmatmul.mubr.msk.bf16.vlgmr.msra.gmra.mrb[12].mxu0 %vm515_vm4, %v3419_v10  ;;  %v3430_v10 = vld [vmem:[%s4180_s5 + $0x20] sm:$0xff]  }
 0x30e   : > { %1566 = vmatpush1.bf16.msra.mxu0 %v3916_v41  ;;  %1597 = vmatprep.mubr.bf16.mxu0 %v3443_v1  ;;  %v3422_v41 = vld [vmem:[%s4178_s3 + $0xd0] sm:$0xff]  }
 0x30f   : > { %1623 = vmatprep.subr.bf16.mxu0 %v3583_v40  ;;  %v2674_v2 = vpop.permute.xlu0 %2673 }
 0x310   : > { %v2675_v17 = vsel %vm2251_vm2, %v2674_v2, %v3930_v47  ;;  %3191 = vmatmul.mubr.msk.bf16.vlgmr.msra.gmra.mrb[12].mxu1 %vm515_vm4, %v3420_v45  ;;  %v1696_v47 = vsel %vm1535_vm3, %v3999_v5, %v3954_v3  ;;  %v1775_v3 = vsel %vm1454_vm15, %v3972_v19, %v4016_v53  ;;  %v3425_v19 = vld [vmem:[%s4178_s3 + $0x78] sm:$0xff]  }
 0x311   : > { %2681 = vmatpush1.bf16.msra.mxu1 %v2675_v17  ;;  %2712 = vmatprep.mubr.bf16.mxu1 %v3443_v1 }
 0x317   : > { %v1982_v33 = vpop.permute.xlu1 %1981 }
 0x319   : > { %3129 = vmatmul.mubr.msk.bf16.vlgmr.msra.gmra.mrb[12].mxu0 %vm515_vm4, %v3421_v20 }
 0x31a   : > { %1624 = vmatpush1.bf16.msra.mxu0 %v3581_v39  ;;  %1655 = vmatprep.mubr.bf16.mxu0 %v3443_v1 }
 0x31b   : > { %1702 = vmatprep.subr.bf16.mxu0 %v1696_v47  ;;  %v2733_v36 = vpop.permute.xlu1 %2732 }
 0x31c   : > { %3195 = vmatmul.mubr.msk.bf16.vlgmr.msra.gmra.mrb[12].mxu1 %vm515_vm4, %v3422_v41 }
 0x31f   : > { %v2841_v45 = vpop.permute.xlu1 %2840 }
 0x320   : > { %v1987_v35 = vpop.permute.xlu0 %1986 }
 0x324   : > { %v2738_v63 = vpop.permute.xlu0 %2737 }
 0x325   : > { %3133 = vmatmul.mubr.msk.bf16.vlgmr.msra.gmra.mrb[12].mxu0 %vm515_vm4, %v3423_v22 }
 0x326   : > { %1703 = vmatpush1.bf16.msra.mxu0 %v1695_v23  ;;  %1734 = vmatprep.mubr.bf16.mxu0 %v3443_v1 }
 0x327   : > { %1781 = vmatprep.subr.bf16.mxu0 %v1775_v3 }
 0x328   : > { %v2846_v20 = vpop.permute.xlu0 %2845 }
 0x331   : > { %3137 = vmatmul.mubr.msk.bf16.vlgmr.msra.gmra.mrb[12].mxu0 %vm515_vm4, %v3424_v24 }
 0x332   : > { %1782 = vmatpush1.bf16.msra.mxu0 %v3979_v21  ;;  %1813 = vmatprep.mubr.bf16.mxu0 %v3443_v1  ;;  %v3426_v21 = vld [vmem:[%s4178_s3 + $0x80] sm:$0xff]  }
 0x333   : > { %1850 = vmatprep.subr.bf16.mxu0 %v1844_v26 }
 0x33d   : > { %3141 = vmatmul.mubr.msk.bf16.vlgmr.msra.gmra.mrb[12].mxu0 %vm515_vm4, %v3425_v19 }
 0x33e   : > { %1851 = vmatpush1.bf16.msra.mxu0 %v1843_v27  ;;  %1882 = vmatprep.mubr.bf16.mxu0 %v3443_v1 }
 0x33f   : > { %1929 = vmatprep.subr.bf16.mxu0 %v1923_v28 }
 0x349   : > { %3145 = vmatmul.mubr.msk.bf16.vlgmr.msra.gmra.mrb[12].mxu0 %vm515_vm4, %v3426_v21 }
 0x34a   : > { %1930 = vmatpush1.bf16.msra.mxu0 %v1922_v30  ;;  %1961 = vmatprep.mubr.bf16.mxu0 %v3443_v1  ;;  %v3433_v30 = vld [vmem:[%s4180_s5 + $0x30] sm:$0xff]  }
 0x355   : > { %3149 = vmatmul.mubr.msk.bf16.vlgmr.msra.gmra.mrb[12].mxu0 %vm515_vm4, %v3427_v32  ;;  %v3434_v32 = vld [vmem:[%s4180_s5 + $0x38] sm:$0xff]  }
 0x356   : > { %2052 = vmatprep.mubr.bf16.mxu0 %v3443_v1 }
 0x3ef   : > { %v2714_v37 = vpop.f32.mrb[12].mxu1 }
 0x3f0   : > { %v2740_v38 = vadd.f32 %v2733_v36, %v2714_v37  ;;  %v2716_v42 = vpop.f32.mrb[13].mxu1 }
 0x3f1   : > { %v2741_v43 = vadd.f32 %v2733_v36, %v2716_v42  ;;  %v2718_v5 = vpop.f32.mrb[14].mxu1 }
 0x3f2   : > { %v2742_v48 = vadd.f32 %v2738_v63, %v2718_v5  ;;  %v2720_v34 = vpop.f32.mrb[15].mxu1  ;;  %v2744_v31 = vmax.f32 %v2740_v38, 0.0 }
 0x3f3   : > { %v2743_v44 = vadd.f32 %v2738_v63, %v2720_v34  ;;  %v2745_v52 = vmax.f32 %v2741_v43, 0.0 }
 0x3f4   : > { %v2746_v51 = vmax.f32 %v2742_v48, 0.0 }
 0x3f5   : > { %v2747_v53 = vmax.f32 %v2743_v44, 0.0 }
 0x3f6   : > { %v2748_v46 = vpack.c.bf16 %v2746_v51, %v2744_v31 }
 0x3f7   : > { %v2749_v49 = vpack.c.bf16 %v2747_v53, %v2745_v52 }
 0x428   : > { %v1963_v50 = vpop.f32.mrb[12].mxu0 }
 0x429   : > { %v1989_v15 = vadd.f32 %v1982_v33, %v1963_v50  ;;  %v1965_v6 = vpop.f32.mrb[13].mxu0 }
 0x42a   : > { %v1990_v59 = vadd.f32 %v1982_v33, %v1965_v6  ;;  %v1967_v60 = vpop.f32.mrb[14].mxu0  ;;  %v416_v33 = vpop.permute.xlu1 %415 }
 0x42b   : > { %v1991_v7 = vadd.f32 %v1987_v35, %v1967_v60  ;;  %v1969_v62 = vpop.f32.mrb[15].mxu0  ;;  %v1993_v61 = vmax.f32 %v1989_v15, 0.0  ;;  %v433_v36 = vadd.f32 %v416_v33, %v3762_v54  ;;  %v434_v37 = vadd.f32 %v416_v33, %v3764_v55 }
 0x42c   : > { %v1992_v0 = vadd.f32 %v1987_v35, %v1969_v62  ;;  %v1994_v29 = vmax.f32 %v1990_v59, 0.0  ;;  %v421_v35 = vpop.permute.xlu0 %420 }
 0x42d   : > { %v1995_v14 = vmax.f32 %v1991_v7, 0.0  ;;  %v435_v42 = vadd.f32 %v421_v35, %v3766_v56 }
 0x42e   : > { %v1996_v4 = vmax.f32 %v1992_v0, 0.0  ;;  %v426_v44 = vpop.permute.xlu1 %425 }
 0x42f   : > { %v1997_v8 = vpack.c.bf16 %v1995_v14, %v1993_v61 }
 0x430   : > { %v1998_v25 = vpack.c.bf16 %v1996_v4, %v1994_v29  ;;  %v431_v52 = vpop.permute.xlu0 %430 }
 0x431   : > { %v439_v50 = vadd.f32 %v431_v52, %v3781_v12  ;;  %v440_v59 = vadd.f32 %v431_v52, %v3783_v13 }
 0x432   : > { %2020 = vmatprep.subr.bf16.mxu0 %v1998_v25 }
 0x433   : > { %2021 = vmatpush1.bf16.msra.mxu0 %v1997_v8 }
 0x434   : > { %2771 = vmatprep.subr.bf16.mxu0 %v2749_v49 }
 0x436   : > { %3158 = vmatmul.mubr.msk.bf16.vlgmr.msra.gmra.mrb[4].mxu0 %vm515_vm4, %v3428_v9 }
 0x437   : > { %2772 = vmatpush1.bf16.msra.mxu0 %v2748_v46  ;;  %2062 = vmatprep.mubr.bf16.mxu0 %v3443_v1  ;;  %v437_v46 = vadd.f32 %v426_v44, %v3770_v58 }
 0x438   : > { %2856 = vmatprep.subr.bf16.mxu0 %v3583_v40  ;;  %v3431_v40 = vld [vmem:[%s4180_s5 + $0x28] sm:$0xff]  }
 0x43e   : > { %3159 = vmatmul.mubr.msk.bf16.gmra.mrb[8].mxu0 %vm515_vm4, %v3429_v16 }
 0x43f   : > { %2803 = vmatprep.mubr.bf16.mxu0 %v3443_v1 }
 0x446   : > { %3204 = vmatmul.mubr.msk.bf16.vlgmr.msra.gmra.mrb[4].mxu0 %vm515_vm4, %v3430_v10 }
 0x447   : > { %2857 = vmatpush1.bf16.msra.mxu0 %v3581_v39  ;;  %2813 = vmatprep.mubr.bf16.mxu0 %v3443_v1 }
 0x44e   : > { %3205 = vmatmul.mubr.msk.bf16.gmra.mrb[8].mxu0 %vm515_vm4, %v3431_v40 }
 0x44f   : > { %2888 = vmatprep.mubr.bf16.mxu0 %v3443_v1 }
 0x456   : > { %3211 = vmatmul.mubr.msk.bf16.vlgmr.msra.gmra.mrb[16].mxu0 %vm515_vm4, %v3432_v18 }
 0x457   : > { %2958 = vmatprep.mubr.bf16.mxu0 %v3443_v1 }
 0x529   : > { %v2890_v39 = vpop.f32.mrb[16].mxu0 }
 0x52a   : > { %v2891_v2 = vadd.f32 %v2890_v39, %v2841_v45  ;;  %v2892_v17 = vpop.f32.mrb[17].mxu0 }
 0x52b   : > { %v2893_v41 = vadd.f32 %v2892_v17, %v2841_v45  ;;  %v2894_v47 = vpop.f32.mrb[18].mxu0 }
 0x52c   : > { %v2895_v22 = vadd.f32 %v2894_v47, %v2846_v20  ;;  %v2896_v23 = vpop.f32.mrb[19].mxu0  ;;  %v2899_v24 = vmax.f32 %v2891_v2, 0.0 }
 0x52d   : > { %v2897_v3 = vadd.f32 %v2896_v23, %v2846_v20  ;;  %v2900_v19 = vmax.f32 %v2893_v41, 0.0 }
 0x52e   : > { %v2901_v26 = vmax.f32 %v2895_v22, 0.0 }
 0x52f   : > { %v2902_v27 = vmax.f32 %v2897_v3, 0.0 }
 0x530   : > { %v2903_v28 = vpack.c.bf16 %v2901_v26, %v2899_v24 }
 0x531   : > { %v2904_v21 = vpack.c.bf16 %v2902_v27, %v2900_v19 }
 0x533   : > { %2926 = vmatprep.subr.bf16.mxu0 %v2904_v21 }
 0x534   : > { %2927 = vmatpush1.bf16.msra.mxu0 %v2903_v28 }
 0x537   : > { %3218 = vmatmul.mubr.msk.bf16.vlgmr.msra.gmra.mrb[4].mxu0 %vm515_vm4, %v3433_v30 }
 0x538   : > { %2968 = vmatprep.mubr.bf16.mxu0 %v3443_v1  ;;  %v436_v1 = vadd.f32 %v421_v35, %v3768_v57  ;;  %v438_v57 = vadd.f32 %v426_v44, %v3779_v11 }
 0x53f   : > { %3219 = vmatmul.mubr.msk.bf16.gmra.mrb[8].mxu0 %vm515_vm4, %v3434_v32 }
 0x60a   : > { %v2960_v38 = vpop.f32.mrb[4].mxu0 }
 0x60b   : > { %v3227_v63 = vadd.f32 %v2960_v38, %v433_v36  ;;  %v2962_v43 = vpop.f32.mrb[5].mxu0 }
 0x60c   : > { %v3229_v5 = vadd.f32 %v2962_v43, %v434_v37  ;;  %v2964_v54 = vpop.f32.mrb[6].mxu0 }
 0x60d   : > { %v2987_v48 = vmax.f32 %v3227_v63, 0.0  ;;  %v3231_v55 = vadd.f32 %v2964_v54, %v435_v42  ;;  %v2966_v34 = vpop.f32.mrb[7].mxu0 }
 0x60e   : > { %v2988_v56 = vmax.f32 %v3229_v5, 0.0  ;;  %v3233_v31 = vadd.f32 %v2966_v34, %v436_v1 }
 0x60f   : > { %2995 = vst [vmem:[%s4157_s22] sm:$0xff] %v2987_v48  ;;  %v2989_v51 = vmax.f32 %v3231_v55, 0.0 }
 0x610   : > { %2996 = vst [vmem:[%s4157_s22 + $0x8] sm:$0xff] %v2988_v56  ;;  %v2990_v53 = vmax.f32 %v3233_v31, 0.0 }
 0x611   : > { %2997 = vst [vmem:[%s4157_s22 + $0x10] sm:$0xff] %v2989_v51 }
 0x612   : > { %2998 = vst [vmem:[%s4157_s22 + $0x18] sm:$0xff] %v2990_v53  ;;  %v2970_v49 = vpop.f32.mrb[8].mxu0 }
 0x613   : > { %v3235_v15 = vadd.f32 %v2970_v49, %v437_v46  ;;  %v2972_v6 = vpop.f32.mrb[9].mxu0 }
 0x614   : > { %v3237_v60 = vadd.f32 %v2972_v6, %v438_v57  ;;  %v2974_v7 = vpop.f32.mrb[10].mxu0 }
 0x615   : > { %v2991_v62 = vmax.f32 %v3235_v15, 0.0  ;;  %v3239_v0 = vadd.f32 %v2974_v7, %v439_v50  ;;  %v2976_v58 = vpop.f32.mrb[11].mxu0 }
 0x616   : > { %v2992_v61 = vmax.f32 %v3237_v60, 0.0  ;;  %v3241_v14 = vadd.f32 %v2976_v58, %v440_v59 }
 0x617   : > { %2999 = vst [vmem:[%s4157_s22 + $0x20] sm:$0xff] %v2991_v62  ;;  %v2993_v11 = vmax.f32 %v3239_v0, 0.0 }
 0x618   : > { %3000 = vst [vmem:[%s4157_s22 + $0x28] sm:$0xff] %v2992_v61  ;;  %v2994_v29 = vmax.f32 %v3241_v14, 0.0 }
 0x619   : > { %3001 = vst [vmem:[%s4157_s22 + $0x30] sm:$0xff] %v2993_v11 }
 0x61a   : > { %3002 = vst [vmem:[%s4157_s22 + $0x38] sm:$0xff] %v2994_v29 }
 0x61b PF: > { %s17_s24 = sadd.s32 1, %s3441_s24  }
 0x61c   : > { %p14_p4 = scmp.ge.s32.totalorder %s17_s24, 4  }
 0x61e   :  { %16 = sbr.rel (!%p14_p4) target bundleno = 1 (0x1), region = 111 }

</bundles_post_ra>
